<compile_context>
chip_gen: v7x
topology: tpu7x:2x2x1
jax: 0.10.0
libtpu: 0.0.40
codegen_flags: <defaults>
</compile_context>

<pallas_src>
import functools

import jax
import jax.numpy as jnp
from jax import lax
from jax.experimental import pallas as pl
from jax.experimental.pallas import tpu as pltpu

EPS = 2.0 ** (-8)


def output_hw(input_hw, kernel_size, padding, stride):
    return (
        int((input_hw[0] + 2 * padding - kernel_size) / stride + 1),
        int((input_hw[1] + 2 * padding - kernel_size) / stride + 1),
    )


def _round_up(x, m):
    return ((x + m - 1) // m) * m


# ----------------------------------------------------------------------------
# Fused BasicBlock kernel (one grid step == one batch sample)
# ----------------------------------------------------------------------------
def _fused_basic_block_kernel(*refs, P2, w_valid, h_out, R, off1, off2, off_sc,
                              has_conv_shortcut, matmul_dtype):
    if has_conv_shortcut:
        (x_ref, mask_ref, w1_ref, g1_ref, b1_ref, w2_ref, g2_ref, b2_ref,
         wsc_ref, gsc_ref, bsc_ref, out_ref, x2_ref) = refs
    else:
        (x_ref, mask_ref, w1_ref, g1_ref, b1_ref, w2_ref, g2_ref, b2_ref,
         out_ref, x2_ref) = refs

    f32 = jnp.float32
    planes = out_ref.shape[-1]
    inv_n = 1.0 / float(h_out * w_valid * planes)
    mask = mask_ref[...]                       # (R, planes) f32; 1 on valid cols

    def mm(lhs, rhs):
        if matmul_dtype is not None:
            lhs = lhs.astype(matmul_dtype)     # weights already cast by wrapper
        return jnp.dot(lhs, rhs, preferred_element_type=f32)

    def masked_layernorm(y, gamma, beta):
        mean = jnp.sum(y * mask) * inv_n
        centered = y - mean
        var = jnp.sum(centered * centered * mask) * inv_n
        return centered * lax.rsqrt(var + EPS) * gamma + beta

    # ---- conv1 (3x3; stride/padding folded into taps by the wrapper) + LN1 + ReLU
    acc = None
    for t, off in enumerate(off1):
        part = mm(x_ref[pl.ds(off, R), :], w1_ref[t])
        acc = part if acc is None else acc + part
    y1 = masked_layernorm(acc, g1_ref[...], b1_ref[...])
    y1 = jnp.maximum(y1, 0.0) * mask           # ReLU; zero the pitch-padding cols

    # ---- re-pitch out1 into the zero-padded conv2 input held entirely in VMEM
    x2_ref[...] = jnp.zeros_like(x2_ref)
    x2_ref[pl.ds(P2 + 1, R), :] = y1

    # ---- conv2 (3x3, stride 1) + LN2
    acc = None
    for t, off in enumerate(off2):
        part = mm(x2_ref[pl.ds(off, R), :], w2_ref[t])
        acc = part if acc is None else acc + part
    y2 = masked_layernorm(acc, g2_ref[...], b2_ref[...])

    # ---- shortcut: 1x1 conv + LN, or identity
    if has_conv_shortcut:
        sc = mm(x_ref[pl.ds(off_sc, R), :], wsc_ref[...])
        res = masked_layernorm(sc, gsc_ref[...], bsc_ref[...])
    else:
        res = x_ref[pl.ds(off_sc, R), :]

    out_ref[...] = jnp.maximum(y2 + res, 0.0).astype(out_ref.dtype)


# ----------------------------------------------------------------------------
# Wrapper: layout prep (cheap XLA glue, no data blowup) + pallas_call
# ----------------------------------------------------------------------------
def _affine_rows(p_chw, P2):
    """(C, h, w) LayerNorm affine -> (h*P2, C) at the kernel's row pitch."""
    C, h, w = p_chw.shape
    a = jnp.transpose(p_chw, (1, 2, 0))                    # (h, w, C)
    a = jnp.pad(a, ((0, 0), (0, P2 - w), (0, 0)))          # (h, P2, C)
    return a.reshape(h * P2, C)


def basic_block_pallas(x_nchw, params, *, stride, matmul_dtype=None):
    N, Cin, H, W = x_nchw.shape
    planes = params["w1"].shape[0]
    h1, w1 = output_hw((H, W), 3, 1, stride)
    h2, w2 = output_hw((h1, w1), 3, 1, 1)
    assert (h2, w2) == (h1, w1)
    h_out, w_valid = h1, w1
    P2 = w_valid + 2                     # common row pitch of all internal slabs
    R = h_out * P2                       # rows of every per-sample slab
    has_sc = (stride != 1) or (Cin != planes)

    x_nhwc = jnp.transpose(x_nchw, (0, 2, 3, 1)).astype(jnp.float32)

    # ---- stage-1 input & conv1 taps: flatten to a fixed-pitch (rows, K) slab ----
    if stride == 1:
        xp = jnp.pad(x_nhwc, ((0, 0), (1, 1), (1, 1), (0, 0)))        # (N, H+2, P2, Cin)
        xflat = xp.reshape(N, (H + 2) * P2, Cin)
        K = Cin
        taps1 = [(dy * P2 + dx, jnp.transpose(params["w1"][:, :, dy, dx]))
                 for dy in range(3) for dx in range(3)]
        if has_sc:
            wsc_mat = jnp.transpose(params["wsc"][:, :, 0, 0])        # (Cin, planes)
        off_sc = P2 + 1                  # residual / 1x1-conv read offset
    elif stride == 2:
        # pad (incl. conv padding) then space-to-depth by 2: pure relayout, no blowup
        Hp = _round_up(H + 2, 2)
        Wp = 2 * P2
        xp = jnp.pad(x_nhwc, ((0, 0), (1, Hp - H - 1), (1, Wp - W - 1), (0, 0)))
        xs = jnp.transpose(xp.reshape(N, Hp // 2, 2, P2, 2, Cin), (0, 1, 3, 2, 4, 5))
        xflat = xs.reshape(N, (Hp // 2) * P2, 4 * Cin)
        K = 4 * Cin
        taps1 = []
        for dyh in range(2):             # 9 taps merge into 4 shifted matmuls
            for dxh in range(2):
                wm = jnp.zeros((2, 2, Cin, planes), params["w1"].dtype)
                for p in range(2):
                    for q in range(2):
                        dy, dx = 2 * dyh + p, 2 * dxh + q
                        if dy < 3 and dx < 3:
                            wm = wm.at[p, q].set(jnp.transpose(params["w1"][:, :, dy, dx]))
                taps1.append((dyh * P2 + dxh, wm.reshape(4 * Cin, planes)))
        wsc_mat = jnp.zeros((2, 2, Cin, planes), params["wsc"].dtype)
        wsc_mat = wsc_mat.at[1, 1].set(jnp.transpose(params["wsc"][:, :, 0, 0]))
        wsc_mat = wsc_mat.reshape(4 * Cin, planes)
        off_sc = 0
    else:
        raise NotImplementedError("stride must be 1 or 2")

    off1 = tuple(o for o, _ in taps1)
    w1taps = jnp.stack([w for _, w in taps1])                         # (T1, K, planes)

    off2 = tuple(dy * P2 + dx for dy in range(3) for dx in range(3))
    w2taps = jnp.stack([jnp.transpose(params["w2"][:, :, dy, dx])
                        for dy in range(3) for dx in range(3)])       # (9, planes, planes)

    rows_needed = max(max(off1) + R, off_sc + R)
    RIN = _round_up(max(rows_needed, xflat.shape[1]), 8)
    xflat = jnp.pad(xflat, ((0, 0), (0, RIN - xflat.shape[1]), (0, 0)))

    RX2 = _round_up((h_out + 2) * P2 + 2, 8)                          # conv2-input scratch rows

    g1r, b1r = _affine_rows(params["g1"], P2), _affine_rows(params["b1"], P2)
    g2r, b2r = _affine_rows(params["g2"], P2), _affine_rows(params["b2"], P2)

    mask = (jnp.arange(R) % P2 < w_valid).astype(jnp.float32)
    mask = jnp.broadcast_to(mask[:, None], (R, planes))

    if matmul_dtype is not None:         # bf16 MXU inputs on v6e/v7x; LN stays f32
        w1taps = w1taps.astype(matmul_dtype)
        w2taps = w2taps.astype(matmul_dtype)
        if has_sc:
            wsc_mat = wsc_mat.astype(matmul_dtype)

    inputs = [xflat, mask, w1taps, g1r, b1r, w2taps, g2r, b2r]
    in_specs = [
        pl.BlockSpec((None, RIN, K), lambda n: (n, 0, 0)),
        pl.BlockSpec((R, planes), lambda n: (0, 0)),
        pl.BlockSpec(w1taps.shape, lambda n: (0, 0, 0)),
        pl.BlockSpec((R, planes), lambda n: (0, 0)),
        pl.BlockSpec((R, planes), lambda n: (0, 0)),
        pl.BlockSpec(w2taps.shape, lambda n: (0, 0, 0)),
        pl.BlockSpec((R, planes), lambda n: (0, 0)),
        pl.BlockSpec((R, planes), lambda n: (0, 0)),
    ]
    if has_sc:
        gscr, bscr = _affine_rows(params["gsc"], P2), _affine_rows(params["bsc"], P2)
        inputs += [wsc_mat, gscr, bscr]
        in_specs += [
            pl.BlockSpec(wsc_mat.shape, lambda n: (0, 0)),
            pl.BlockSpec((R, planes), lambda n: (0, 0)),
            pl.BlockSpec((R, planes), lambda n: (0, 0)),
        ]

    kernel = functools.partial(
        _fused_basic_block_kernel,
        P2=P2, w_valid=w_valid, h_out=h_out, R=R,
        off1=off1, off2=off2, off_sc=off_sc,
        has_conv_shortcut=has_sc, matmul_dtype=matmul_dtype)

    out = pl.pallas_call(
        kernel,
        out_shape=jax.ShapeDtypeStruct((N, R, planes), jnp.float32),
        grid=(N,),
        in_specs=in_specs,
        out_specs=pl.BlockSpec((None, R, planes), lambda n: (n, 0, 0)),
        scratch_shapes=[pltpu.VMEM((RX2, planes), jnp.float32)],
        compiler_params=pltpu.CompilerParams(
            dimension_semantics=("parallel",),
            vmem_limit_bytes=32 * 1024 * 1024),
    )(*inputs)

    # drop the pitch-padding columns and return NCHW like the PyTorch module
    out = out.reshape(N, h_out, P2, planes)[:, :, :w_valid, :]
    return jnp.transpose(out, (0, 3, 1, 2))


# ----------------------------------------------------------------------------
# Pure-JAX reference
# ----------------------------------------------------------------------------
def _ref_conv(x_nchw, w_oihw, stride, padding):
    return lax.conv_general_dilated(
        x_nchw, w_oihw, window_strides=(stride, stride),
        padding=((padding, padding), (padding, padding)),
        dimension_numbers=("NCHW", "OIHW", "NCHW"))


def _ref_ln(x_nchw, gamma_chw, beta_chw):
    mean = jnp.mean(x_nchw, axis=(1, 2, 3), keepdims=True)
    var = jnp.mean((x_nchw - mean) ** 2, axis=(1, 2, 3), keepdims=True)
    return (x_nchw - mean) / jnp.sqrt(var + EPS) * gamma_chw[None] + beta_chw[None]


def basic_block_ref(x_nchw, params, *, stride):
    N, Cin, H, W = x_nchw.shape
    planes = params["w1"].shape[0]
    out = jax.nn.relu(_ref_ln(_ref_conv(x_nchw, params["w1"], stride, 1),
                              params["g1"], params["b1"]))
    out = _ref_ln(_ref_conv(out, params["w2"], 1, 1), params["g2"], params["b2"])
    if stride != 1 or Cin != planes:
        sc = _ref_ln(_ref_conv(x_nchw, params["wsc"], stride, 0),
                     params["gsc"], params["bsc"])
    else:
        sc = x_nchw
    return jax.nn.relu(out + sc)


# ----------------------------------------------------------------------------
if __name__ == "__main__":
    key = jax.random.PRNGKey(0)

    def make_params(k, cin, planes, h1, w1, h2, w2, with_shortcut, hs=None, ws=None):
        ks = jax.random.split(k, 9)
        p = {
            "w1": 0.1 * jax.random.normal(ks[0], (planes, cin, 3, 3), jnp.float32),
            "w2": 0.1 * jax.random.normal(ks[1], (planes, planes, 3, 3), jnp.float32),
            "g1": 1.0 + 0.1 * jax.random.normal(ks[2], (planes, h1, w1), jnp.float32),
            "b1": 0.1 * jax.random.normal(ks[3], (planes, h1, w1), jnp.float32),
            "g2": 1.0 + 0.1 * jax.random.normal(ks[4], (planes, h2, w2), jnp.float32),
            "b2": 0.1 * jax.random.normal(ks[5], (planes, h2, w2), jnp.float32),
        }
        if with_shortcut:
            p["wsc"] = 0.1 * jax.random.normal(ks[6], (planes, cin, 1, 1), jnp.float32)
            p["gsc"] = 1.0 + 0.1 * jax.random.normal(ks[7], (planes, hs, ws), jnp.float32)
            p["bsc"] = 0.1 * jax.random.normal(ks[8], (planes, hs, ws), jnp.float32)
        return p

    # ---- Test 1: stride=2, projection shortcut (N=2, Cin=4, 16x16 -> planes=8, 8x8)
    N, Cin, H, W, planes, stride = 2, 4, 16, 16, 8, 2
    h1, w1 = output_hw((H, W), 3, 1, stride)
    h2, w2 = output_hw((h1, w1), 3, 1, 1)
    hs, ws = output_hw((H, W), 1, 0, stride)
    k_x, k_p, key = jax.random.split(key, 3)
    x = jax.random.normal(k_x, (N, Cin, H, W), jnp.float32)
    params = make_params(k_p, Cin, planes, h1, w1, h2, w2, True, hs, ws)

    out = jax.block_until_ready(basic_block_pallas(x, params, stride=stride))
    ref = jax.block_until_ready(basic_block_ref(x, params, stride=stride))
    assert out.shape == (N, planes, h2, w2), out.shape
    assert jnp.allclose(out, ref, atol=1e-4, rtol=1e-4), float(jnp.max(jnp.abs(out - ref)))

    # ---- Test 2: stride=1, identity shortcut (Cin == planes == 8)
    Cin1 = planes
    k_x1, k_p1, key = jax.random.split(key, 3)
    x1 = jax.random.normal(k_x1, (N, Cin1, H, W), jnp.float32)
    params1 = make_params(k_p1, Cin1, planes, H, W, H, W, False)
    out1 = jax.block_until_ready(basic_block_pallas(x1, params1, stride=1))
    ref1 = jax.block_until_ready(basic_block_ref(x1, params1, stride=1))
    assert out1.shape == (N, planes, H, W), out1.shape
    assert jnp.allclose(out1, ref1, atol=1e-4, rtol=1e-4), float(jnp.max(jnp.abs(out1 - ref1)))

    # ---- Test 3: bf16 MXU-input path (the v6e/v7x configuration), looser tolerance
    out_bf16 = jax.block_until_ready(
        basic_block_pallas(x, params, stride=2, matmul_dtype=jnp.bfloat16))
    assert jnp.allclose(out_bf16, ref, atol=1e-1, rtol=1e-1), \
        float(jnp.max(jnp.abs(out_bf16 - ref)))

    print("KERNEL_OK")
</pallas_src>

<mosaic_0001>
module attributes {stable_mosaic.version = 11 : i64} {
  func.func @_fused_basic_block_kernel(%arg0: i32, %arg1: memref<1x96x16xf32, #tpu.memory_space<vmem>>, %arg2: memref<80x8xf32, #tpu.memory_space<vmem>>, %arg3: memref<4x16x8xf32, #tpu.memory_space<vmem>>, %arg4: memref<80x8xf32, #tpu.memory_space<vmem>>, %arg5: memref<80x8xf32, #tpu.memory_space<vmem>>, %arg6: memref<9x8x8xf32, #tpu.memory_space<vmem>>, %arg7: memref<80x8xf32, #tpu.memory_space<vmem>>, %arg8: memref<80x8xf32, #tpu.memory_space<vmem>>, %arg9: memref<16x8xf32, #tpu.memory_space<vmem>>, %arg10: memref<80x8xf32, #tpu.memory_space<vmem>>, %arg11: memref<80x8xf32, #tpu.memory_space<vmem>>, %arg12: memref<1x80x8xf32, #tpu.memory_space<vmem>>, %arg13: memref<104x8xf32, #tpu.memory_space<vmem>>) attributes {dimension_semantics = [#tpu.dimension_semantics<parallel>], iteration_bounds = array<i64: 2>, scalar_prefetch = 0 : i64, scratch_operands = 1 : i64, tpu.core_type = #tpu.core_type<tc>, window_params = [{transform_indices = @transform_0, window_bounds = array<i64: 1, 96, 16>}, {pipeline_mode = #tpu.pipeline_mode<synchronous>, transform_indices = @transform_1, window_bounds = array<i64: 80, 8>}, {pipeline_mode = #tpu.pipeline_mode<synchronous>, transform_indices = @transform_2, window_bounds = array<i64: 4, 16, 8>}, {pipeline_mode = #tpu.pipeline_mode<synchronous>, transform_indices = @transform_3, window_bounds = array<i64: 80, 8>}, {pipeline_mode = #tpu.pipeline_mode<synchronous>, transform_indices = @transform_4, window_bounds = array<i64: 80, 8>}, {pipeline_mode = #tpu.pipeline_mode<synchronous>, transform_indices = @transform_5, window_bounds = array<i64: 9, 8, 8>}, {pipeline_mode = #tpu.pipeline_mode<synchronous>, transform_indices = @transform_6, window_bounds = array<i64: 80, 8>}, {pipeline_mode = #tpu.pipeline_mode<synchronous>, transform_indices = @transform_7, window_bounds = array<i64: 80, 8>}, {pipeline_mode = #tpu.pipeline_mode<synchronous>, transform_indices = @transform_8, window_bounds = array<i64: 16, 8>}, {pipeline_mode = #tpu.pipeline_mode<synchronous>, transform_indices = @transform_9, window_bounds = array<i64: 80, 8>}, {pipeline_mode = #tpu.pipeline_mode<synchronous>, transform_indices = @transform_10, window_bounds = array<i64: 80, 8>}, {transform_indices = @transform_11, window_bounds = array<i64: 1, 80, 8>}]} {
    %c0 = arith.constant 0 : index
    %c0_0 = arith.constant 0 : index
    %0 = vector.load %arg2[%c0, %c0_0] : memref<80x8xf32, #tpu.memory_space<vmem>>, vector<80x8xf32>
    %c0_1 = arith.constant 0 : index
    %c0_2 = arith.constant 0 : index
    %c0_3 = arith.constant 0 : index
    %1 = vector.load %arg1[%c0_1, %c0_2, %c0_3] : memref<1x96x16xf32, #tpu.memory_space<vmem>>, vector<1x80x16xf32>
    %2 = vector.shape_cast %1 : vector<1x80x16xf32> to vector<80x16xf32>
    %c0_4 = arith.constant 0 : index
    %c0_5 = arith.constant 0 : index
    %c0_6 = arith.constant 0 : index
    %3 = vector.load %arg3[%c0_4, %c0_5, %c0_6] : memref<4x16x8xf32, #tpu.memory_space<vmem>>, vector<1x16x8xf32>
    %4 = vector.shape_cast %3 : vector<1x16x8xf32> to vector<16x8xf32>
    %cst = arith.constant dense<0.000000e+00> : vector<80x8xf32>
    %5 = tpu.matmul %2, %4, %cst {dimension_numbers = #tpu.dot_dimension_numbers<[1], [0], [0], [1], [0, 0, 1, 1], [], []>} : vector<80x16xf32>, vector<16x8xf32>, vector<80x8xf32> -> vector<80x8xf32>
    %c0_7 = arith.constant 0 : index
    %c1 = arith.constant 1 : index
    %c0_8 = arith.constant 0 : index
    %6 = vector.load %arg1[%c0_7, %c1, %c0_8] : memref<1x96x16xf32, #tpu.memory_space<vmem>>, vector<1x80x16xf32>
    %7 = vector.shape_cast %6 : vector<1x80x16xf32> to vector<80x16xf32>
    %c1_9 = arith.constant 1 : index
    %c0_10 = arith.constant 0 : index
    %c0_11 = arith.constant 0 : index
    %8 = vector.load %arg3[%c1_9, %c0_10, %c0_11] : memref<4x16x8xf32, #tpu.memory_space<vmem>>, vector<1x16x8xf32>
    %9 = vector.shape_cast %8 : vector<1x16x8xf32> to vector<16x8xf32>
    %cst_12 = arith.constant dense<0.000000e+00> : vector<80x8xf32>
    %10 = tpu.matmul %7, %9, %cst_12 {dimension_numbers = #tpu.dot_dimension_numbers<[1], [0], [0], [1], [0, 0, 1, 1], [], []>} : vector<80x16xf32>, vector<16x8xf32>, vector<80x8xf32> -> vector<80x8xf32>
    %11 = arith.addf %5, %10 : vector<80x8xf32>
    %c0_13 = arith.constant 0 : index
    %c10 = arith.constant 10 : index
    %c0_14 = arith.constant 0 : index
    %12 = vector.load %arg1[%c0_13, %c10, %c0_14] : memref<1x96x16xf32, #tpu.memory_space<vmem>>, vector<1x80x16xf32>
    %13 = vector.shape_cast %12 : vector<1x80x16xf32> to vector<80x16xf32>
    %c2 = arith.constant 2 : index
    %c0_15 = arith.constant 0 : index
    %c0_16 = arith.constant 0 : index
    %14 = vector.load %arg3[%c2, %c0_15, %c0_16] : memref<4x16x8xf32, #tpu.memory_space<vmem>>, vector<1x16x8xf32>
    %15 = vector.shape_cast %14 : vector<1x16x8xf32> to vector<16x8xf32>
    %cst_17 = arith.constant dense<0.000000e+00> : vector<80x8xf32>
    %16 = tpu.matmul %13, %15, %cst_17 {dimension_numbers = #tpu.dot_dimension_numbers<[1], [0], [0], [1], [0, 0, 1, 1], [], []>} : vector<80x16xf32>, vector<16x8xf32>, vector<80x8xf32> -> vector<80x8xf32>
    %17 = arith.addf %11, %16 : vector<80x8xf32>
    %c0_18 = arith.constant 0 : index
    %c11 = arith.constant 11 : index
    %c0_19 = arith.constant 0 : index
    %18 = vector.load %arg1[%c0_18, %c11, %c0_19] : memref<1x96x16xf32, #tpu.memory_space<vmem>>, vector<1x80x16xf32>
    %19 = vector.shape_cast %18 : vector<1x80x16xf32> to vector<80x16xf32>
    %c3 = arith.constant 3 : index
    %c0_20 = arith.constant 0 : index
    %c0_21 = arith.constant 0 : index
    %20 = vector.load %arg3[%c3, %c0_20, %c0_21] : memref<4x16x8xf32, #tpu.memory_space<vmem>>, vector<1x16x8xf32>
    %21 = vector.shape_cast %20 : vector<1x16x8xf32> to vector<16x8xf32>
    %cst_22 = arith.constant dense<0.000000e+00> : vector<80x8xf32>
    %22 = tpu.matmul %19, %21, %cst_22 {dimension_numbers = #tpu.dot_dimension_numbers<[1], [0], [0], [1], [0, 0, 1, 1], [], []>} : vector<80x16xf32>, vector<16x8xf32>, vector<80x8xf32> -> vector<80x8xf32>
    %23 = arith.addf %17, %22 : vector<80x8xf32>
    %c0_23 = arith.constant 0 : index
    %c0_24 = arith.constant 0 : index
    %24 = vector.load %arg4[%c0_23, %c0_24] : memref<80x8xf32, #tpu.memory_space<vmem>>, vector<80x8xf32>
    %c0_25 = arith.constant 0 : index
    %c0_26 = arith.constant 0 : index
    %25 = vector.load %arg5[%c0_25, %c0_26] : memref<80x8xf32, #tpu.memory_space<vmem>>, vector<80x8xf32>
    %26 = arith.mulf %23, %0 : vector<80x8xf32>
    %27 = vector.shape_cast %26 : vector<80x8xf32> to vector<1x80x8xf32>
    %cst_27 = arith.constant dense<0.000000e+00> : vector<1xf32>
    %28 = vector.multi_reduction <add>, %27, %cst_27 [1, 2] : vector<1x80x8xf32> to vector<1xf32>
    %29 = vector.shape_cast %28 : vector<1xf32> to vector<1x1x1xf32>
    %30 = vector.extract %29[0, 0, 0] : f32 from vector<1x1x1xf32>
    %cst_28 = arith.constant 0.001953125 : f32
    %31 = arith.mulf %30, %cst_28 : f32
    %32 = vector.broadcast %31 : f32 to vector<80x8xf32>
    %33 = arith.subf %23, %32 : vector<80x8xf32>
    %34 = arith.mulf %33, %33 : vector<80x8xf32>
    %35 = arith.mulf %34, %0 : vector<80x8xf32>
    %36 = vector.shape_cast %35 : vector<80x8xf32> to vector<1x80x8xf32>
    %cst_29 = arith.constant dense<0.000000e+00> : vector<1xf32>
    %37 = vector.multi_reduction <add>, %36, %cst_29 [1, 2] : vector<1x80x8xf32> to vector<1xf32>
    %38 = vector.shape_cast %37 : vector<1xf32> to vector<1x1x1xf32>
    %39 = vector.extract %38[0, 0, 0] : f32 from vector<1x1x1xf32>
    %cst_30 = arith.constant 0.001953125 : f32
    %40 = arith.mulf %39, %cst_30 : f32
    %cst_31 = arith.constant 3.906250e-03 : f32
    %41 = arith.addf %40, %cst_31 : f32
    %42 = math.rsqrt %41 : f32
    %43 = vector.broadcast %42 : f32 to vector<80x8xf32>
    %44 = arith.mulf %33, %43 : vector<80x8xf32>
    %45 = arith.mulf %44, %24 : vector<80x8xf32>
    %46 = arith.addf %45, %25 : vector<80x8xf32>
    %cst_32 = arith.constant 0.000000e+00 : f32
    %47 = vector.broadcast %cst_32 : f32 to vector<80x8xf32>
    %48 = arith.maximumf %46, %47 : vector<80x8xf32>
    %49 = arith.mulf %48, %0 : vector<80x8xf32>
    %cst_33 = arith.constant 0.000000e+00 : f32
    %50 = vector.broadcast %cst_33 : f32 to vector<104x8xf32>
    %c0_34 = arith.constant 0 : index
    %c0_35 = arith.constant 0 : index
    %51 = vector.load %arg13[%c0_34, %c0_35] : memref<104x8xf32, #tpu.memory_space<vmem>>, vector<104x8xf32>
    tpu.vector_store %arg13[%c0_34, %c0_35], %50 {strides = array<i32>} : memref<104x8xf32, #tpu.memory_space<vmem>>, vector<104x8xf32>,
    %c11_36 = arith.constant 11 : index
    %c0_37 = arith.constant 0 : index
    %52 = vector.load %arg13[%c11_36, %c0_37] : memref<104x8xf32, #tpu.memory_space<vmem>>, vector<80x8xf32>
    tpu.vector_store %arg13[%c11_36, %c0_37], %49 {strides = array<i32>} : memref<104x8xf32, #tpu.memory_space<vmem>>, vector<80x8xf32>,
    %c0_38 = arith.constant 0 : index
    %c0_39 = arith.constant 0 : index
    %53 = vector.load %arg13[%c0_38, %c0_39] : memref<104x8xf32, #tpu.memory_space<vmem>>, vector<80x8xf32>
    %c0_40 = arith.constant 0 : index
    %c0_41 = arith.constant 0 : index
    %c0_42 = arith.constant 0 : index
    %54 = vector.load %arg6[%c0_40, %c0_41, %c0_42] : memref<9x8x8xf32, #tpu.memory_space<vmem>>, vector<1x8x8xf32>
    %55 = vector.shape_cast %54 : vector<1x8x8xf32> to vector<8x8xf32>
    %cst_43 = arith.constant dense<0.000000e+00> : vector<80x8xf32>
    %56 = tpu.matmul %53, %55, %cst_43 {dimension_numbers = #tpu.dot_dimension_numbers<[1], [0], [0], [1], [0, 0, 1, 1], [], []>} : vector<80x8xf32>, vector<8x8xf32>, vector<80x8xf32> -> vector<80x8xf32>
    %c1_44 = arith.constant 1 : index
    %c0_45 = arith.constant 0 : index
    %57 = vector.load %arg13[%c1_44, %c0_45] : memref<104x8xf32, #tpu.memory_space<vmem>>, vector<80x8xf32>
    %c1_46 = arith.constant 1 : index
    %c0_47 = arith.constant 0 : index
    %c0_48 = arith.constant 0 : index
    %58 = vector.load %arg6[%c1_46, %c0_47, %c0_48] : memref<9x8x8xf32, #tpu.memory_space<vmem>>, vector<1x8x8xf32>
    %59 = vector.shape_cast %58 : vector<1x8x8xf32> to vector<8x8xf32>
    %cst_49 = arith.constant dense<0.000000e+00> : vector<80x8xf32>
    %60 = tpu.matmul %57, %59, %cst_49 {dimension_numbers = #tpu.dot_dimension_numbers<[1], [0], [0], [1], [0, 0, 1, 1], [], []>} : vector<80x8xf32>, vector<8x8xf32>, vector<80x8xf32> -> vector<80x8xf32>
    %61 = arith.addf %56, %60 : vector<80x8xf32>
    %c2_50 = arith.constant 2 : index
    %c0_51 = arith.constant 0 : index
    %62 = vector.load %arg13[%c2_50, %c0_51] : memref<104x8xf32, #tpu.memory_space<vmem>>, vector<80x8xf32>
    %c2_52 = arith.constant 2 : index
    %c0_53 = arith.constant 0 : index
    %c0_54 = arith.constant 0 : index
    %63 = vector.load %arg6[%c2_52, %c0_53, %c0_54] : memref<9x8x8xf32, #tpu.memory_space<vmem>>, vector<1x8x8xf32>
    %64 = vector.shape_cast %63 : vector<1x8x8xf32> to vector<8x8xf32>
    %cst_55 = arith.constant dense<0.000000e+00> : vector<80x8xf32>
    %65 = tpu.matmul %62, %64, %cst_55 {dimension_numbers = #tpu.dot_dimension_numbers<[1], [0], [0], [1], [0, 0, 1, 1], [], []>} : vector<80x8xf32>, vector<8x8xf32>, vector<80x8xf32> -> vector<80x8xf32>
    %66 = arith.addf %61, %65 : vector<80x8xf32>
    %c10_56 = arith.constant 10 : index
    %c0_57 = arith.constant 0 : index
    %67 = vector.load %arg13[%c10_56, %c0_57] : memref<104x8xf32, #tpu.memory_space<vmem>>, vector<80x8xf32>
    %c3_58 = arith.constant 3 : index
    %c0_59 = arith.constant 0 : index
    %c0_60 = arith.constant 0 : index
    %68 = vector.load %arg6[%c3_58, %c0_59, %c0_60] : memref<9x8x8xf32, #tpu.memory_space<vmem>>, vector<1x8x8xf32>
    %69 = vector.shape_cast %68 : vector<1x8x8xf32> to vector<8x8xf32>
    %cst_61 = arith.constant dense<0.000000e+00> : vector<80x8xf32>
    %70 = tpu.matmul %67, %69, %cst_61 {dimension_numbers = #tpu.dot_dimension_numbers<[1], [0], [0], [1], [0, 0, 1, 1], [], []>} : vector<80x8xf32>, vector<8x8xf32>, vector<80x8xf32> -> vector<80x8xf32>
    %71 = arith.addf %66, %70 : vector<80x8xf32>
    %c11_62 = arith.constant 11 : index
    %c0_63 = arith.constant 0 : index
    %72 = vector.load %arg13[%c11_62, %c0_63] : memref<104x8xf32, #tpu.memory_space<vmem>>, vector<80x8xf32>
    %c4 = arith.constant 4 : index
    %c0_64 = arith.constant 0 : index
    %c0_65 = arith.constant 0 : index
    %73 = vector.load %arg6[%c4, %c0_64, %c0_65] : memref<9x8x8xf32, #tpu.memory_space<vmem>>, vector<1x8x8xf32>
    %74 = vector.shape_cast %73 : vector<1x8x8xf32> to vector<8x8xf32>
    %cst_66 = arith.constant dense<0.000000e+00> : vector<80x8xf32>
    %75 = tpu.matmul %72, %74, %cst_66 {dimension_numbers = #tpu.dot_dimension_numbers<[1], [0], [0], [1], [0, 0, 1, 1], [], []>} : vector<80x8xf32>, vector<8x8xf32>, vector<80x8xf32> -> vector<80x8xf32>
    %76 = arith.addf %71, %75 : vector<80x8xf32>
    %c12 = arith.constant 12 : index
    %c0_67 = arith.constant 0 : index
    %77 = vector.load %arg13[%c12, %c0_67] : memref<104x8xf32, #tpu.memory_space<vmem>>, vector<80x8xf32>
    %c5 = arith.constant 5 : index
    %c0_68 = arith.constant 0 : index
    %c0_69 = arith.constant 0 : index
    %78 = vector.load %arg6[%c5, %c0_68, %c0_69] : memref<9x8x8xf32, #tpu.memory_space<vmem>>, vector<1x8x8xf32>
    %79 = vector.shape_cast %78 : vector<1x8x8xf32> to vector<8x8xf32>
    %cst_70 = arith.constant dense<0.000000e+00> : vector<80x8xf32>
    %80 = tpu.matmul %77, %79, %cst_70 {dimension_numbers = #tpu.dot_dimension_numbers<[1], [0], [0], [1], [0, 0, 1, 1], [], []>} : vector<80x8xf32>, vector<8x8xf32>, vector<80x8xf32> -> vector<80x8xf32>
    %81 = arith.addf %76, %80 : vector<80x8xf32>
    %c20 = arith.constant 20 : index
    %c0_71 = arith.constant 0 : index
    %82 = vector.load %arg13[%c20, %c0_71] : memref<104x8xf32, #tpu.memory_space<vmem>>, vector<80x8xf32>
    %c6 = arith.constant 6 : index
    %c0_72 = arith.constant 0 : index
    %c0_73 = arith.constant 0 : index
    %83 = vector.load %arg6[%c6, %c0_72, %c0_73] : memref<9x8x8xf32, #tpu.memory_space<vmem>>, vector<1x8x8xf32>
    %84 = vector.shape_cast %83 : vector<1x8x8xf32> to vector<8x8xf32>
    %cst_74 = arith.constant dense<0.000000e+00> : vector<80x8xf32>
    %85 = tpu.matmul %82, %84, %cst_74 {dimension_numbers = #tpu.dot_dimension_numbers<[1], [0], [0], [1], [0, 0, 1, 1], [], []>} : vector<80x8xf32>, vector<8x8xf32>, vector<80x8xf32> -> vector<80x8xf32>
    %86 = arith.addf %81, %85 : vector<80x8xf32>
    %c21 = arith.constant 21 : index
    %c0_75 = arith.constant 0 : index
    %87 = vector.load %arg13[%c21, %c0_75] : memref<104x8xf32, #tpu.memory_space<vmem>>, vector<80x8xf32>
    %c7 = arith.constant 7 : index
    %c0_76 = arith.constant 0 : index
    %c0_77 = arith.constant 0 : index
    %88 = vector.load %arg6[%c7, %c0_76, %c0_77] : memref<9x8x8xf32, #tpu.memory_space<vmem>>, vector<1x8x8xf32>
    %89 = vector.shape_cast %88 : vector<1x8x8xf32> to vector<8x8xf32>
    %cst_78 = arith.constant dense<0.000000e+00> : vector<80x8xf32>
    %90 = tpu.matmul %87, %89, %cst_78 {dimension_numbers = #tpu.dot_dimension_numbers<[1], [0], [0], [1], [0, 0, 1, 1], [], []>} : vector<80x8xf32>, vector<8x8xf32>, vector<80x8xf32> -> vector<80x8xf32>
    %91 = arith.addf %86, %90 : vector<80x8xf32>
    %c22 = arith.constant 22 : index
    %c0_79 = arith.constant 0 : index
    %92 = vector.load %arg13[%c22, %c0_79] : memref<104x8xf32, #tpu.memory_space<vmem>>, vector<80x8xf32>
    %c8 = arith.constant 8 : index
    %c0_80 = arith.constant 0 : index
    %c0_81 = arith.constant 0 : index
    %93 = vector.load %arg6[%c8, %c0_80, %c0_81] : memref<9x8x8xf32, #tpu.memory_space<vmem>>, vector<1x8x8xf32>
    %94 = vector.shape_cast %93 : vector<1x8x8xf32> to vector<8x8xf32>
    %cst_82 = arith.constant dense<0.000000e+00> : vector<80x8xf32>
    %95 = tpu.matmul %92, %94, %cst_82 {dimension_numbers = #tpu.dot_dimension_numbers<[1], [0], [0], [1], [0, 0, 1, 1], [], []>} : vector<80x8xf32>, vector<8x8xf32>, vector<80x8xf32> -> vector<80x8xf32>
    %96 = arith.addf %91, %95 : vector<80x8xf32>
    %c0_83 = arith.constant 0 : index
    %c0_84 = arith.constant 0 : index
    %97 = vector.load %arg7[%c0_83, %c0_84] : memref<80x8xf32, #tpu.memory_space<vmem>>, vector<80x8xf32>
    %c0_85 = arith.constant 0 : index
    %c0_86 = arith.constant 0 : index
    %98 = vector.load %arg8[%c0_85, %c0_86] : memref<80x8xf32, #tpu.memory_space<vmem>>, vector<80x8xf32>
    %99 = arith.mulf %96, %0 : vector<80x8xf32>
    %100 = vector.shape_cast %99 : vector<80x8xf32> to vector<1x80x8xf32>
    %cst_87 = arith.constant dense<0.000000e+00> : vector<1xf32>
    %101 = vector.multi_reduction <add>, %100, %cst_87 [1, 2] : vector<1x80x8xf32> to vector<1xf32>
    %102 = vector.shape_cast %101 : vector<1xf32> to vector<1x1x1xf32>
    %103 = vector.extract %102[0, 0, 0] : f32 from vector<1x1x1xf32>
    %cst_88 = arith.constant 0.001953125 : f32
    %104 = arith.mulf %103, %cst_88 : f32
    %105 = vector.broadcast %104 : f32 to vector<80x8xf32>
    %106 = arith.subf %96, %105 : vector<80x8xf32>
    %107 = arith.mulf %106, %106 : vector<80x8xf32>
    %108 = arith.mulf %107, %0 : vector<80x8xf32>
    %109 = vector.shape_cast %108 : vector<80x8xf32> to vector<1x80x8xf32>
    %cst_89 = arith.constant dense<0.000000e+00> : vector<1xf32>
    %110 = vector.multi_reduction <add>, %109, %cst_89 [1, 2] : vector<1x80x8xf32> to vector<1xf32>
    %111 = vector.shape_cast %110 : vector<1xf32> to vector<1x1x1xf32>
    %112 = vector.extract %111[0, 0, 0] : f32 from vector<1x1x1xf32>
    %cst_90 = arith.constant 0.001953125 : f32
    %113 = arith.mulf %112, %cst_90 : f32
    %cst_91 = arith.constant 3.906250e-03 : f32
    %114 = arith.addf %113, %cst_91 : f32
    %115 = math.rsqrt %114 : f32
    %116 = vector.broadcast %115 : f32 to vector<80x8xf32>
    %117 = arith.mulf %106, %116 : vector<80x8xf32>
    %118 = arith.mulf %117, %97 : vector<80x8xf32>
    %119 = arith.addf %118, %98 : vector<80x8xf32>
    %c0_92 = arith.constant 0 : index
    %c0_93 = arith.constant 0 : index
    %c0_94 = arith.constant 0 : index
    %120 = vector.load %arg1[%c0_92, %c0_93, %c0_94] : memref<1x96x16xf32, #tpu.memory_space<vmem>>, vector<1x80x16xf32>
    %121 = vector.shape_cast %120 : vector<1x80x16xf32> to vector<80x16xf32>
    %c0_95 = arith.constant 0 : index
    %c0_96 = arith.constant 0 : index
    %122 = vector.load %arg9[%c0_95, %c0_96] : memref<16x8xf32, #tpu.memory_space<vmem>>, vector<16x8xf32>
    %cst_97 = arith.constant dense<0.000000e+00> : vector<80x8xf32>
    %123 = tpu.matmul %121, %122, %cst_97 {dimension_numbers = #tpu.dot_dimension_numbers<[1], [0], [0], [1], [0, 0, 1, 1], [], []>} : vector<80x16xf32>, vector<16x8xf32>, vector<80x8xf32> -> vector<80x8xf32>
    %c0_98 = arith.constant 0 : index
    %c0_99 = arith.constant 0 : index
    %124 = vector.load %arg10[%c0_98, %c0_99] : memref<80x8xf32, #tpu.memory_space<vmem>>, vector<80x8xf32>
    %c0_100 = arith.constant 0 : index
    %c0_101 = arith.constant 0 : index
    %125 = vector.load %arg11[%c0_100, %c0_101] : memref<80x8xf32, #tpu.memory_space<vmem>>, vector<80x8xf32>
    %126 = arith.mulf %123, %0 : vector<80x8xf32>
    %127 = vector.shape_cast %126 : vector<80x8xf32> to vector<1x80x8xf32>
    %cst_102 = arith.constant dense<0.000000e+00> : vector<1xf32>
    %128 = vector.multi_reduction <add>, %127, %cst_102 [1, 2] : vector<1x80x8xf32> to vector<1xf32>
    %129 = vector.shape_cast %128 : vector<1xf32> to vector<1x1x1xf32>
    %130 = vector.extract %129[0, 0, 0] : f32 from vector<1x1x1xf32>
    %cst_103 = arith.constant 0.001953125 : f32
    %131 = arith.mulf %130, %cst_103 : f32
    %132 = vector.broadcast %131 : f32 to vector<80x8xf32>
    %133 = arith.subf %123, %132 : vector<80x8xf32>
    %134 = arith.mulf %133, %133 : vector<80x8xf32>
    %135 = arith.mulf %134, %0 : vector<80x8xf32>
    %136 = vector.shape_cast %135 : vector<80x8xf32> to vector<1x80x8xf32>
    %cst_104 = arith.constant dense<0.000000e+00> : vector<1xf32>
    %137 = vector.multi_reduction <add>, %136, %cst_104 [1, 2] : vector<1x80x8xf32> to vector<1xf32>
    %138 = vector.shape_cast %137 : vector<1xf32> to vector<1x1x1xf32>
    %139 = vector.extract %138[0, 0, 0] : f32 from vector<1x1x1xf32>
    %cst_105 = arith.constant 0.001953125 : f32
    %140 = arith.mulf %139, %cst_105 : f32
    %cst_106 = arith.constant 3.906250e-03 : f32
    %141 = arith.addf %140, %cst_106 : f32
    %142 = math.rsqrt %141 : f32
    %143 = vector.broadcast %142 : f32 to vector<80x8xf32>
    %144 = arith.mulf %133, %143 : vector<80x8xf32>
    %145 = arith.mulf %144, %124 : vector<80x8xf32>
    %146 = arith.addf %145, %125 : vector<80x8xf32>
    %147 = arith.addf %119, %146 : vector<80x8xf32>
    %cst_107 = arith.constant 0.000000e+00 : f32
    %148 = vector.broadcast %cst_107 : f32 to vector<80x8xf32>
    %149 = arith.maximumf %147, %148 : vector<80x8xf32>
    %c0_108 = arith.constant 0 : index
    %c0_109 = arith.constant 0 : index
    %c0_110 = arith.constant 0 : index
    %150 = vector.load %arg12[%c0_108, %c0_109, %c0_110] : memref<1x80x8xf32, #tpu.memory_space<vmem>>, vector<1x80x8xf32>
    %151 = vector.shape_cast %150 : vector<1x80x8xf32> to vector<80x8xf32>
    %152 = vector.shape_cast %149 : vector<80x8xf32> to vector<1x80x8xf32>
    tpu.vector_store %arg12[%c0_108, %c0_109, %c0_110], %152 {strides = array<i32>} : memref<1x80x8xf32, #tpu.memory_space<vmem>>, vector<1x80x8xf32>,
    return
  }
  func.func @transform_0(%arg0: i32) -> (i32, i32, i32) {
    %c0_i32 = arith.constant 0 : i32
    %c0_i32_0 = arith.constant 0 : i32
    %c0_i32_1 = arith.constant 0 : i32
    return %arg0, %c0_i32, %c0_i32_0 : i32, i32, i32
  }
  func.func @transform_1(%arg0: i32) -> (i32, i32) {
    %c0_i32 = arith.constant 0 : i32
    %c0_i32_0 = arith.constant 0 : i32
    %c0_i32_1 = arith.constant 0 : i32
    return %c0_i32, %c0_i32_0 : i32, i32
  }
  func.func @transform_2(%arg0: i32) -> (i32, i32, i32) {
    %c0_i32 = arith.constant 0 : i32
    %c0_i32_0 = arith.constant 0 : i32
    %c0_i32_1 = arith.constant 0 : i32
    %c0_i32_2 = arith.constant 0 : i32
    return %c0_i32, %c0_i32_0, %c0_i32_1 : i32, i32, i32
  }
  func.func @transform_3(%arg0: i32) -> (i32, i32) {
    %c0_i32 = arith.constant 0 : i32
    %c0_i32_0 = arith.constant 0 : i32
    %c0_i32_1 = arith.constant 0 : i32
    return %c0_i32, %c0_i32_0 : i32, i32
  }
  func.func @transform_4(%arg0: i32) -> (i32, i32) {
    %c0_i32 = arith.constant 0 : i32
    %c0_i32_0 = arith.constant 0 : i32
    %c0_i32_1 = arith.constant 0 : i32
    return %c0_i32, %c0_i32_0 : i32, i32
  }
  func.func @transform_5(%arg0: i32) -> (i32, i32, i32) {
    %c0_i32 = arith.constant 0 : i32
    %c0_i32_0 = arith.constant 0 : i32
    %c0_i32_1 = arith.constant 0 : i32
    %c0_i32_2 = arith.constant 0 : i32
    return %c0_i32, %c0_i32_0, %c0_i32_1 : i32, i32, i32
  }
  func.func @transform_6(%arg0: i32) -> (i32, i32) {
    %c0_i32 = arith.constant 0 : i32
    %c0_i32_0 = arith.constant 0 : i32
    %c0_i32_1 = arith.constant 0 : i32
    return %c0_i32, %c0_i32_0 : i32, i32
  }
  func.func @transform_7(%arg0: i32) -> (i32, i32) {
    %c0_i32 = arith.constant 0 : i32
    %c0_i32_0 = arith.constant 0 : i32
    %c0_i32_1 = arith.constant 0 : i32
    return %c0_i32, %c0_i32_0 : i32, i32
  }
  func.func @transform_8(%arg0: i32) -> (i32, i32) {
    %c0_i32 = arith.constant 0 : i32
    %c0_i32_0 = arith.constant 0 : i32
    %c0_i32_1 = arith.constant 0 : i32
    return %c0_i32, %c0_i32_0 : i32, i32
  }
  func.func @transform_9(%arg0: i32) -> (i32, i32) {
    %c0_i32 = arith.constant 0 : i32
    %c0_i32_0 = arith.constant 0 : i32
    %c0_i32_1 = arith.constant 0 : i32
    return %c0_i32, %c0_i32_0 : i32, i32
  }
  func.func @transform_10(%arg0: i32) -> (i32, i32) {
    %c0_i32 = arith.constant 0 : i32
    %c0_i32_0 = arith.constant 0 : i32
    %c0_i32_1 = arith.constant 0 : i32
    return %c0_i32, %c0_i32_0 : i32, i32
  }
  func.func @transform_11(%arg0: i32) -> (i32, i32, i32) {
    %c0_i32 = arith.constant 0 : i32
    %c0_i32_0 = arith.constant 0 : i32
    %c0_i32_1 = arith.constant 0 : i32
    return %arg0, %c0_i32, %c0_i32_0 : i32, i32, i32
  }
}

</mosaic_0001>

<bundles_post_ra>
// kernel: tpu_custom_call.1
= control target key start
LH: loop header
LB: loop body
LE: loop exit
PB: predicated region body
PF: predicated region fallthrough
CT: control target
= control target key end

     0   :  { %s4093_s17 = smov 0   ;;  %s5068_s0 = inlined_call_operand.vmem [shape: f32[2,96,16], index: 0, kind: input, shape index: {}]   ;;  %s5069_s1 = inlined_call_operand.vmem [shape: f32[80,8], index: 1, kind: input, shape index: {}]   ;;  %s5070_s2 = inlined_call_operand.vmem [shape: f32[4,16,8], index: 2, kind: input, shape index: {}]   ;;  %s5071_s3 = inlined_call_operand.vmem [shape: f32[80,8], index: 3, kind: input, shape index: {}]   ;;  %s5072_s4 = inlined_call_operand.vmem [shape: f32[80,8], index: 4, kind: input, shape index: {}]   ;;  %s5073_s5 = inlined_call_operand.vmem [shape: f32[9,8,8], index: 5, kind: input, shape index: {}]   ;;  %s5074_s6 = inlined_call_operand.vmem [shape: f32[80,8], index: 6, kind: input, shape index: {}]   ;;  %s5075_s7 = inlined_call_operand.vmem [shape: f32[80,8], index: 7, kind: input, shape index: {}]   ;;  %s5076_s8 = inlined_call_operand.vmem [shape: f32[16,8], index: 8, kind: input, shape index: {}]   ;;  %s5077_s9 = inlined_call_operand.vmem [shape: f32[80,8], index: 9, kind: input, shape index: {}]   ;;  %s5078_s10 = inlined_call_operand.vmem [shape: f32[80,8], index: 10, kind: input, shape index: {}]   ;;  %s5079_s11 = inlined_call_operand.vmem [shape: f32[2,80,8], index: 11, kind: output, shape index: {}]  }
   0x1 LB: > { %s3279_s18 = sadd.s32 4294967295, %s4030_s17   ;;  %p3283_p0 = scmp.ge.s32.totalorder %s4030_s17, 1  ;;  %s4030_s17 = sphi %s4093_s17, %s21_s17  }
   0x2   : > { %p337_p1 = scmp.lt.s32.totalorder %s4030_s17, 3 }
   0x4   : > { %p338_p2 = pnand %p3283_p0, %p337_p1 }
   0x5   : > { %v3286_v0 = vld [vmem:[%s5070_s2 + $0x10] sm:$0xff] (!%p338_p2)  ;;  %v3287_v1 = vld [vmem:[%s5070_s2 + $0x18] sm:$0xff] (!%p338_p2)  ;;  %p377_p3 = scmp.lt.s32.totalorder (!%p338_p2), %s3279_s18, 1  ;;  %v407_v2 = vld [vmem:[%s5070_s2] sm:$0xff] (!%p338_p2)  ;;  %vm422_vm0 = vcmask (!%p338_p2), 130048   ;;  %vm1079_vm1 = vcmask (!%p338_p2), 64512  }
   0x6   : > { %341 = sbr.rel (%p338_p2) target bundleno = 2016 (0x7e0), region = 64  ;;  %v3849_v3 = vpack.c.bf16 (!%p338_p2), %v3287_v1, %v3286_v0  ;;  %v408_v4 = vld [vmem:[%s5070_s2 + $0x8] sm:$0xff] (!%p338_p2)  ;;  %v3308_v6 = vld [vmem:[%s5070_s2 + $0x20] sm:$0xff] (!%p338_p2)  ;;  %v3320_v20 = vld [vmem:[%s5070_s2 + $0x30] sm:$0xff] (!%p338_p2) }
   0x7   : > { %v3853_v5 = vpack.c.bf16 (!%p338_p2), %v408_v4, %v407_v2  ;;  %v3309_v7 = vld [vmem:[%s5070_s2 + $0x28] sm:$0xff] (!%p338_p2)  ;;  %v3321_v21 = vld [vmem:[%s5070_s2 + $0x38] sm:$0xff] (!%p338_p2)  ;;  %v4221_v53 = vld [vmem:[%s5069_s1] sm:$0xff] (!%p338_p2) }
   0x8   : > { %3850 = vmatprep.subr.bf16.mxu0 (!%p338_p2), %v3849_v3  ;;  %v3857_v11 = vpack.c.bf16 (!%p338_p2), %v3309_v7, %v3308_v6  ;;  %v3861_v24 = vpack.c.bf16 (!%p338_p2), %v3321_v21, %v3320_v20  ;;  %v4216_v52 = vld [vmem:[%s5069_s1 + $0x8] sm:$0xff] (!%p338_p2)  ;;  %v4229_v59 = vld [vmem:[%s5069_s1 + $0x18] sm:$0xff] (!%p338_p2)  ;;  %v4234_v60 = vld [vmem:[%s5069_s1 + $0x10] sm:$0xff] (!%p338_p2) }
   0x9   : > { %3852 = vmatpush3.bf16.msra.mxu0 (!%p338_p2), %v3849_v3  ;;  %v4242_v3 = vld [vmem:[%s5069_s1 + $0x28] sm:$0xff] (!%p338_p2)  ;;  %v4247_v4 = vld [vmem:[%s5069_s1 + $0x20] sm:$0xff] (!%p338_p2) }
   0xa   : > { %3854 = vmatprep.subr.bf16.mxu0 (!%p338_p2), %v3853_v5 }
   0xd   : > { %s5081_s18 = smov (!%p377_p3, %s3279_s18), 1 }
   0xe   : > { %s3979_s27 = smul.u32 96, %s5081_s18 }
  0x10   : > { %s4125_s15 = scalar_lea.vmem %s5068_s0, %s3979_s27 }
  0x11   : > { %v409_v8 = vld [vmem:[%s4125_s15 + $0x1] sm:$0xff]  ;;  %v410_v9 = vld [vmem:[%s4125_s15 + $0x9] sm:$0xff]  ;;  %v411_v10 = vld [vmem:[%s4125_s15 + $0x11] sm:$0xff] }
  0x12   : > { %3605 = vmatprep.mubr.msk.f32.mxu0 %vm422_vm0, %v409_v8  ;;  %v412_v12 = vld [vmem:[%s4125_s15 + $0x19] sm:$0xff]  ;;  %v413_v13 = vld [vmem:[%s4125_s15 + $0x21] sm:$0xff]  ;;  %v414_v14 = vld [vmem:[%s4125_s15 + $0x29] sm:$0xff] }
  0x13   : > { %3606 = vmatmul.mubr.msk.f32.vlgmr.msra.gmra.mrb[0].mxu0 %vm422_vm0, %v410_v9  ;;  %v415_v15 = vld [vmem:[%s4125_s15 + $0x31] sm:$0xff]  ;;  %v416_v16 = vld [vmem:[%s4125_s15 + $0x39] sm:$0xff]  ;;  %v417_v17 = vld [vmem:[%s4125_s15 + $0x41] sm:$0xff] }
  0x14   : > { %3856 = vmatpush3.bf16.msra.mxu0 %v3853_v5  ;;  %3608 = vmatprep.mubr.msk.f32.mxu0 %vm422_vm0, %v411_v10  ;;  %v418_v18 = vld [vmem:[%s4125_s15 + $0x49] sm:$0xff]  ;;  %v397_v19 = vld [vmem:[%s4125_s15] sm:$0xff]  ;;  %v400_v25 = vld [vmem:[%s4125_s15 + $0x18] sm:$0xff] }
  0x15   : > { %3858 = vmatprep.subr.bf16.mxu0 %v3857_v11  ;;  %v398_v22 = vld [vmem:[%s4125_s15 + $0x8] sm:$0xff]  ;;  %v399_v23 = vld [vmem:[%s4125_s15 + $0x10] sm:$0xff]  ;;  %v401_v26 = vld [vmem:[%s4125_s15 + $0x20] sm:$0xff] }
  0x16   : > { %v402_v27 = vld [vmem:[%s4125_s15 + $0x28] sm:$0xff]  ;;  %v403_v28 = vld [vmem:[%s4125_s15 + $0x30] sm:$0xff]  ;;  %v404_v29 = vld [vmem:[%s4125_s15 + $0x38] sm:$0xff] }
  0x17   : > { %3609 = vmatmul.mubr.msk.f32.gmra.mrb[2].mxu0 %vm422_vm0, %v412_v12  ;;  %v405_v30 = vld [vmem:[%s4125_s15 + $0x40] sm:$0xff]  ;;  %v406_v31 = vld [vmem:[%s4125_s15 + $0x48] sm:$0xff]  ;;  %v714_v33 = vld [vmem:[%s4125_s15 + $0x12] sm:$0xff] }
  0x18   : > { %3611 = vmatprep.mubr.msk.f32.mxu0 %vm422_vm0, %v413_v13  ;;  %v713_v32 = vld [vmem:[%s4125_s15 + $0xa] sm:$0xff]  ;;  %v715_v34 = vld [vmem:[%s4125_s15 + $0x1a] sm:$0xff]  ;;  %v716_v35 = vld [vmem:[%s4125_s15 + $0x22] sm:$0xff] }
  0x19   : > { %v717_v36 = vld [vmem:[%s4125_s15 + $0x2a] sm:$0xff]  ;;  %v718_v37 = vld [vmem:[%s4125_s15 + $0x32] sm:$0xff]  ;;  %v719_v38 = vld [vmem:[%s4125_s15 + $0x3a] sm:$0xff] }
  0x1a   : > { %v720_v39 = vld [vmem:[%s4125_s15 + $0x42] sm:$0xff]  ;;  %v721_v40 = vld [vmem:[%s4125_s15 + $0x4a] sm:$0xff]  ;;  %v722_v41 = vld [vmem:[%s4125_s15 + $0x52] sm:$0xff] }
  0x1b   : > { %3612 = vmatmul.mubr.msk.f32.gmra.mrb[4].mxu0 %vm422_vm0, %v414_v14  ;;  %v881_v42 = vld [vmem:[%s4125_s15 + $0xb] sm:$0xff]  ;;  %v882_v43 = vld [vmem:[%s4125_s15 + $0x13] sm:$0xff]  ;;  %v883_v44 = vld [vmem:[%s4125_s15 + $0x1b] sm:$0xff] }
  0x1c   : > { %3614 = vmatprep.mubr.msk.f32.mxu0 %vm422_vm0, %v415_v15  ;;  %v884_v45 = vld [vmem:[%s4125_s15 + $0x23] sm:$0xff]  ;;  %v885_v46 = vld [vmem:[%s4125_s15 + $0x2b] sm:$0xff]  ;;  %v886_v47 = vld [vmem:[%s4125_s15 + $0x33] sm:$0xff] }
  0x1d   : > { %v887_v48 = vld [vmem:[%s4125_s15 + $0x3b] sm:$0xff]  ;;  %v888_v49 = vld [vmem:[%s4125_s15 + $0x43] sm:$0xff]  ;;  %v889_v50 = vld [vmem:[%s4125_s15 + $0x4b] sm:$0xff] }
  0x1e   : > { %v890_v51 = vld [vmem:[%s4125_s15 + $0x53] sm:$0xff] }
  0x1f   : > { %3615 = vmatmul.mubr.msk.f32.gmra.mrb[6].mxu0 %vm422_vm0, %v416_v16  ;;  %v4256_v13 = vld [vmem:[%s5069_s1 + $0x38] sm:$0xff]  ;;  %v4261_v14 = vld [vmem:[%s5069_s1 + $0x30] sm:$0xff] }
  0x20   : > { %3617 = vmatprep.mubr.msk.f32.mxu0 %vm422_vm0, %v417_v17 }
  0x23   : > { %3618 = vmatmul.mubr.msk.f32.gmra.mrb[8].mxu0 %vm422_vm0, %v418_v18 }
  0x24   : > { %3624 = vmatprep.mubr.msk.f32.mxu0 %vm422_vm0, %v397_v19 }
  0x27   : > { %3625 = vmatmul.mubr.msk.f32.vlgmr.msra.gmra.mrb[0].mxu0 %vm422_vm0, %v398_v22 }
  0x28   : > { %3860 = vmatpush3.bf16.msra.mxu0 %v3857_v11  ;;  %3627 = vmatprep.mubr.msk.f32.mxu0 %vm422_vm0, %v399_v23  ;;  %v4270_v23 = vld [vmem:[%s5069_s1 + $0x48] sm:$0xff] }
  0x29   : > { %3862 = vmatprep.subr.bf16.mxu0 %v3861_v24 }
  0x2b   : > { %3628 = vmatmul.mubr.msk.f32.gmra.mrb[2].mxu0 %vm422_vm0, %v400_v25 }
  0x2c   : > { %3630 = vmatprep.mubr.msk.f32.mxu0 %vm422_vm0, %v401_v26 }
  0x2f   : > { %3631 = vmatmul.mubr.msk.f32.gmra.mrb[4].mxu0 %vm422_vm0, %v402_v27 }
  0x30   : > { %3633 = vmatprep.mubr.msk.f32.mxu0 %vm422_vm0, %v403_v28 }
  0x33   : > { %3634 = vmatmul.mubr.msk.f32.gmra.mrb[6].mxu0 %vm422_vm0, %v404_v29 }
  0x34   : > { %3636 = vmatprep.mubr.msk.f32.mxu0 %vm422_vm0, %v405_v30 }
  0x37   : > { %3637 = vmatmul.mubr.msk.f32.gmra.mrb[8].mxu0 %vm422_vm0, %v406_v31 }
  0x38   : > { %3643 = vmatprep.mubr.msk.f32.mxu0 %vm422_vm0, %v713_v32 }
  0x3b   : > { %3644 = vmatmul.mubr.msk.f32.vlgmr.msra.gmra.mrb[0].mxu0 %vm422_vm0, %v714_v33 }
  0x3c   : > { %3864 = vmatpush3.bf16.msra.mxu0 %v3861_v24  ;;  %3646 = vmatprep.mubr.msk.f32.mxu0 %vm422_vm0, %v715_v34  ;;  %v4275_v24 = vld [vmem:[%s5069_s1 + $0x40] sm:$0xff] }
  0x3f   : > { %3647 = vmatmul.mubr.msk.f32.gmra.mrb[2].mxu0 %vm422_vm0, %v716_v35 }
  0x40   : > { %3649 = vmatprep.mubr.msk.f32.mxu0 %vm422_vm0, %v717_v36 }
  0x43   : > { %3650 = vmatmul.mubr.msk.f32.gmra.mrb[4].mxu0 %vm422_vm0, %v718_v37 }
  0x44   : > { %3652 = vmatprep.mubr.msk.f32.mxu0 %vm422_vm0, %v719_v38 }
  0x47   : > { %3653 = vmatmul.mubr.msk.f32.gmra.mrb[6].mxu0 %vm422_vm0, %v720_v39 }
  0x48   : > { %3655 = vmatprep.mubr.msk.f32.mxu0 %vm422_vm0, %v721_v40 }
  0x4b   : > { %3656 = vmatmul.mubr.msk.f32.gmra.mrb[8].mxu0 %vm422_vm0, %v722_v41 }
  0x4c   : > { %3662 = vmatprep.mubr.msk.f32.mxu0 %vm422_vm0, %v881_v42 }
  0x4f   : > { %3663 = vmatmul.mubr.msk.f32.vlgmr.msra.gmra.mrb[0].mxu0 %vm422_vm0, %v882_v43 }
  0x50   : > { %3665 = vmatprep.mubr.msk.f32.mxu0 %vm422_vm0, %v883_v44 }
  0x53   : > { %3666 = vmatmul.mubr.msk.f32.gmra.mrb[2].mxu0 %vm422_vm0, %v884_v45 }
  0x54   : > { %3668 = vmatprep.mubr.msk.f32.mxu0 %vm422_vm0, %v885_v46 }
  0x57   : > { %3669 = vmatmul.mubr.msk.f32.gmra.mrb[4].mxu0 %vm422_vm0, %v886_v47 }
  0x58   : > { %3671 = vmatprep.mubr.msk.f32.mxu0 %vm422_vm0, %v887_v48 }
  0x5b   : > { %3672 = vmatmul.mubr.msk.f32.gmra.mrb[6].mxu0 %vm422_vm0, %v888_v49 }
  0x5c   : > { %3674 = vmatprep.mubr.msk.f32.mxu0 %vm422_vm0, %v889_v50 }
  0x5f   : > { %3675 = vmatmul.mubr.msk.f32.gmra.mrb[8].mxu0 %vm422_vm0, %v890_v51 }
 0x122   : > { %v3664_v54 = vpop.f32.mrb[0].mxu0 }
 0x123   : > { %v1070_v55 = vmul.f32 %v3664_v54, %v4216_v52  ;;  %v990_v56 = vpop.f32.mrb[1].mxu0 }
 0x124   : > { %v1069_v57 = vmul.f32 %v990_v56, %v4221_v53 }
 0x125   : > { %v1081_v58 = vsel %vm1079_vm1, %v1070_v55, 0.0 }
 0x126   : > { %v1080_v61 = vsel %vm1079_vm1, %v1069_v57, 0.0  ;;  %v3667_v62 = vpop.f32.mrb[2].mxu0 }
 0x127   : > { %v1082_v63 = vadd.f32 %v1081_v58, %v1080_v61  ;;  %v1000_v0 = vpop.f32.mrb[3].mxu0  ;;  %v1072_v1 = vmul.f32 %v3667_v62, %v4229_v59 }
 0x128   : > { %v1071_v2 = vmul.f32 %v1000_v0, %v4234_v60 }
 0x129   : > { %v1085_v9 = vsel %vm1079_vm1, %v1072_v1, 0.0 }
 0x12a   : > { %v1083_v5 = vsel %vm1079_vm1, %v1071_v2, 0.0  ;;  %v3670_v6 = vpop.f32.mrb[4].mxu0 }
 0x12b   : > { %v1084_v7 = vadd.f32 %v1083_v5, %v1082_v63  ;;  %v1010_v8 = vpop.f32.mrb[5].mxu0  ;;  %v1074_v10 = vmul.f32 %v3670_v6, %v4242_v3 }
 0x12c   : > { %v1073_v11 = vmul.f32 %v1010_v8, %v4247_v4 }
 0x12d   : > { %v1086_v12 = vadd.f32 %v1085_v9, %v1084_v7  ;;  %v1089_v19 = vsel %vm1079_vm1, %v1074_v10, 0.0 }
 0x12e   : > { %v1087_v15 = vsel %vm1079_vm1, %v1073_v11, 0.0  ;;  %v3673_v16 = vpop.f32.mrb[6].mxu0 }
 0x12f   : > { %v1088_v17 = vadd.f32 %v1087_v15, %v1086_v12  ;;  %v1020_v18 = vpop.f32.mrb[7].mxu0  ;;  %v1076_v20 = vmul.f32 %v3673_v16, %v4256_v13 }
 0x130   : > { %v1075_v21 = vmul.f32 %v1020_v18, %v4261_v14 }
 0x131   : > { %v1090_v22 = vadd.f32 %v1089_v19, %v1088_v17  ;;  %v1093_v29 = vsel %vm1079_vm1, %v1076_v20, 0.0 }
 0x132   : > { %v1091_v25 = vsel %vm1079_vm1, %v1075_v21, 0.0  ;;  %v3676_v26 = vpop.f32.mrb[8].mxu0 }
 0x133   : > { %v1092_v27 = vadd.f32 %v1091_v25, %v1090_v22  ;;  %v1030_v28 = vpop.f32.mrb[9].mxu0  ;;  %v1078_v30 = vmul.f32 %v3676_v26, %v4270_v23 }
 0x134   : > { %v1077_v31 = vmul.f32 %v1030_v28, %v4275_v24 }
 0x135   : > { %v1094_v32 = vadd.f32 %v1093_v29, %v1092_v27  ;;  %v1097_v35 = vsel %vm1079_vm1, %v1078_v30, 0.0 }
 0x136   : > { %v1095_v33 = vsel %vm1079_vm1, %v1077_v31, 0.0 }
 0x137   : > { %v1096_v34 = vadd.f32 %v1095_v33, %v1094_v32 }
 0x139   : > { %v1098_v36 = vadd.f32 %v1097_v35, %v1096_v34 }
 0x13b   : > { %1099 = vadd.xlane.f32.xlu0 %v1098_v36 }
 0x1c8   : > { %v1100_v37 = vpop.xlane.xlu0 %1099 }
 0x1c9   : > { %v1101_v38 = vrot.slane %v1100_v37, 4 }
 0x1cb   : > { %v1102_v39 = vadd.f32 %v1101_v38, %v1100_v37 }
 0x1cd   : > { %v1103_v40 = vrot.slane %v1102_v39, 2 }
 0x1cf   : > { %v1104_v41 = vadd.f32 %v1103_v40, %v1102_v39 }
 0x1d1   : > { %v1105_v42 = vrot.slane %v1104_v41, 1 }
 0x1d3   : > { %v1106_v43 = vadd.f32 %v1105_v42, %v1104_v41 }
 0x1d5   : > { %3981 = vpush %v1106_v43 }
 0x206   : > { %s3982_s26 = spop %3981 }
 0x207   : > { %s1108_s27 = smul.f32 0.001953125, %s3982_s26 }
 0x209   : > { %v1109_v44 = vstv %s1108_s27 }
 0x20a   : > { %v4283_v45 = vsub.f32 %v990_v56, %v1109_v44  ;;  %v4285_v46 = vsub.f32 %v3664_v54, %v1109_v44  ;;  %v4287_v47 = vsub.f32 %v1000_v0, %v1109_v44  ;;  %v4289_v48 = vsub.f32 %v3667_v62, %v1109_v44 }
 0x20b   : > { %v4291_v49 = vsub.f32 %v1010_v8, %v1109_v44  ;;  %v4297_v55 = vsub.f32 %v3670_v6, %v1109_v44  ;;  %v4303_v57 = vsub.f32 %v1020_v18, %v1109_v44  ;;  %v4310_v0 = vsub.f32 %v3673_v16, %v1109_v44 }
 0x20c   : > { %v1120_v50 = vmul.f32 %v4283_v45, %v4283_v45  ;;  %v1121_v51 = vmul.f32 %v4285_v46, %v4285_v46  ;;  %v1122_v56 = vmul.f32 %v4287_v47, %v4287_v47  ;;  %v1123_v54 = vmul.f32 %v4289_v48, %v4289_v48 }
 0x20d   : > { %v1124_v58 = vmul.f32 %v4291_v49, %v4291_v49  ;;  %v1125_v1 = vmul.f32 %v4297_v55, %v4297_v55  ;;  %v4317_v8 = vsub.f32 %v1030_v28, %v1109_v44  ;;  %v1126_v9 = vmul.f32 %v4303_v57, %v4303_v57 }
 0x20e   : > { %v1130_v61 = vmul.f32 %v1120_v50, %v4221_v53  ;;  %v1131_v62 = vmul.f32 %v1121_v51, %v4216_v52  ;;  %v1132_v63 = vmul.f32 %v1122_v56, %v4234_v60  ;;  %v1133_v2 = vmul.f32 %v1123_v54, %v4229_v59  ;;  %v3353_v56 = vld [vmem:[%s5073_s5 + $0x10] sm:$0xff]  ;;  %v3332_v54 = vld [vmem:[%s5073_s5 + $0x8] sm:$0xff] }
 0x20f   : > { %v1134_v10 = vmul.f32 %v1124_v58, %v4247_v4  ;;  %v4323_v15 = vsub.f32 %v3676_v26, %v1109_v44  ;;  %v1127_v16 = vmul.f32 %v4310_v0, %v4310_v0  ;;  %v1135_v17 = vmul.f32 %v1125_v1, %v4242_v3  ;;  %3711 = vmatprep.subr.mxu1 %v3353_v56  ;;  %v4373_v1 = vld [vmem:[%s5073_s5] sm:$0xff] }
 0x210   : > { %v1140_v5 = vsel %vm1079_vm1, %v1130_v61, 0.0  ;;  %v1141_v6 = vsel %vm1079_vm1, %v1131_v62, 0.0  ;;  %v1143_v11 = vsel %vm1079_vm1, %v1132_v63, 0.0  ;;  %v1145_v18 = vsel %vm1079_vm1, %v1133_v2, 0.0  ;;  %3677 = vmatprep.subr.mxu0 %v3332_v54  ;;  %3712 = vmatpush3.msra.mxu1 %v3353_v56  ;;  %v4365_v61 = vld [vmem:[%s5073_s5 + $0x18] sm:$0xff] }
 0x211   : > { %v1142_v7 = vadd.f32 %v1141_v6, %v1140_v5  ;;  %v1128_v20 = vmul.f32 %v4317_v8, %v4317_v8  ;;  %v1136_v21 = vmul.f32 %v1126_v9, %v4261_v14  ;;  %v1147_v22 = vsel %vm1079_vm1, %v1134_v10, 0.0  ;;  %3678 = vmatpush3.msra.mxu0 %v3332_v54  ;;  %3728 = vmatprep.subr.mxu1 %v4365_v61  ;;  %v1049_v6 = vld [vmem:[%s5071_s3] sm:$0xff]  ;;  %v1051_v9 = vld [vmem:[%s5071_s3 + $0x10] sm:$0xff]  ;;  %v1052_v10 = vld [vmem:[%s5071_s3 + $0x18] sm:$0xff] }
 0x212   : > { %v1129_v26 = vmul.f32 %v4323_v15, %v4323_v15  ;;  %v1137_v27 = vmul.f32 %v1127_v16, %v4256_v13  ;;  %v1149_v28 = vsel %vm1079_vm1, %v1135_v17, 0.0  ;;  %v4032_v58 = vmov 0.0   ;;  %3694 = vmatprep.subr.mxu0 %v4373_v1  ;;  %v1055_v17 = vld [vmem:[%s5071_s3 + $0x30] sm:$0xff] }
 0x213   : > { %v1144_v12 = vadd.f32 %v1143_v11, %v1142_v7  ;;  %v1138_v30 = vmul.f32 %v1128_v20, %v4275_v24  ;;  %v1151_v31 = vsel %vm1079_vm1, %v1136_v21, 0.0  ;;  %1224 = vst.msk [vmem:[#allocation2] sm:$0xff] %vm1079_vm1, %v4032_v58  ;;  %1225 = vst.msk [vmem:[#allocation2 + $0x8] sm:$0xff] %vm1079_vm1, %v4032_v58  ;;  %v1050_v7 = vld [vmem:[%s5071_s3 + $0x8] sm:$0xff]  ;;  %v1053_v11 = vld [vmem:[%s5071_s3 + $0x20] sm:$0xff] }
 0x214   : > { %v1139_v33 = vmul.f32 %v1129_v26, %v4270_v23  ;;  %v1153_v34 = vsel %vm1079_vm1, %v1137_v27, 0.0  ;;  %1226 = vst.msk [vmem:[#allocation2 + $0x10] sm:$0xff] %vm1079_vm1, %v4032_v58  ;;  %1227 = vst.msk [vmem:[#allocation2 + $0x18] sm:$0xff] %vm1079_vm1, %v4032_v58  ;;  %v1058_v26 = vld [vmem:[%s5071_s3 + $0x48] sm:$0xff]  ;;  %v1059_v27 = vld [vmem:[%s5072_s4] sm:$0xff] }
 0x215   : > { %v1146_v19 = vadd.f32 %v1145_v18, %v1144_v12  ;;  %v1155_v36 = vsel %vm1079_vm1, %v1138_v30, 0.0  ;;  %1228 = vst.msk [vmem:[#allocation2 + $0x20] sm:$0xff] %vm1079_vm1, %v4032_v58  ;;  %1229 = vst.msk [vmem:[#allocation2 + $0x28] sm:$0xff] %vm1079_vm1, %v4032_v58  ;;  %v1054_v12 = vld [vmem:[%s5071_s3 + $0x28] sm:$0xff]  ;;  %v1056_v18 = vld [vmem:[%s5071_s3 + $0x38] sm:$0xff] }
 0x216   : > { %v1157_v38 = vsel %vm1079_vm1, %v1139_v33, 0.0  ;;  %1230 = vst.msk [vmem:[#allocation2 + $0x30] sm:$0xff] %vm1079_vm1, %v4032_v58  ;;  %1231 = vst.msk [vmem:[#allocation2 + $0x38] sm:$0xff] %vm1079_vm1, %v4032_v58  ;;  %v1062_v30 = vld [vmem:[%s5072_s4 + $0x18] sm:$0xff]  ;;  %v1065_v33 = vld [vmem:[%s5072_s4 + $0x30] sm:$0xff] }
 0x217   : > { %v1148_v25 = vadd.f32 %v1147_v22, %v1146_v19  ;;  %1232 = vst.msk [vmem:[#allocation2 + $0x40] sm:$0xff] %vm1079_vm1, %v4032_v58  ;;  %1233 = vst.msk [vmem:[#allocation2 + $0x48] sm:$0xff] %vm1079_vm1, %v4032_v58  ;;  %v1057_v19 = vld [vmem:[%s5071_s3 + $0x40] sm:$0xff] }
 0x218   : > { %1234 = vst.msk [vmem:[#allocation2 + $0x50] sm:$0xff] %vm1079_vm1, %v4032_v58  ;;  %1235 = vst.msk [vmem:[#allocation2 + $0x58] sm:$0xff] %vm1079_vm1, %v4032_v58 }
 0x219   : > { %v1150_v29 = vadd.f32 %v1149_v28, %v1148_v25  ;;  %1236 = vst.msk [vmem:[#allocation2 + $0x60] sm:$0xff] %vm1079_vm1, %v4032_v58  ;;  %v1060_v28 = vld [vmem:[%s5072_s4 + $0x8] sm:$0xff] }
 0x21a   : > { %v1258_v62 = vld [vmem:[#allocation2 + $0x1] sm:$0xff] }
 0x21b   : > { %v1152_v32 = vadd.f32 %v1151_v31, %v1150_v29  ;;  %v1560_v63 = vld [vmem:[#allocation2 + $0x2] sm:$0xff]  ;;  %3679 = vmatprep.mubr.msk.f32.mxu0 %vm1079_vm1, %v1258_v62  ;;  %v1061_v29 = vld [vmem:[%s5072_s4 + $0x10] sm:$0xff] }
 0x21c   : > { %3713 = vmatprep.mubr.msk.f32.mxu1 %vm1079_vm1, %v1560_v63  ;;  %v1063_v31 = vld [vmem:[%s5072_s4 + $0x20] sm:$0xff] }
 0x21d   : > { %v1154_v35 = vadd.f32 %v1153_v34, %v1152_v32  ;;  %v1066_v34 = vld [vmem:[%s5072_s4 + $0x38] sm:$0xff] }
 0x21f   : > { %v1156_v37 = vadd.f32 %v1155_v36, %v1154_v35 }
 0x221   : > { %v1158_v39 = vadd.f32 %v1157_v38, %v1156_v37  ;;  %v1068_v38 = vld [vmem:[%s5072_s4 + $0x48] sm:$0xff] }
 0x223   : > { %1159 = vadd.xlane.f32.xlu0 %v1158_v39 }
 0x2b0   : > { %v1160_v40 = vpop.xlane.xlu0 %1159 }
 0x2b1   : > { %v1161_v41 = vrot.slane %v1160_v40, 4 }
 0x2b3   : > { %v1162_v42 = vadd.f32 %v1161_v41, %v1160_v40 }
 0x2b5   : > { %v1163_v43 = vrot.slane %v1162_v42, 2 }
 0x2b7   : > { %v1164_v44 = vadd.f32 %v1163_v43, %v1162_v42 }
 0x2b9   : > { %v1165_v50 = vrot.slane %v1164_v44, 1 }
 0x2bb   : > { %v1166_v51 = vadd.f32 %v1165_v50, %v1164_v44 }
 0x2bd   : > { %3983 = vpush %v1166_v51 }
 0x2ee   : > { %s3984_s20 = spop %3983 }
 0x2ef   : > { %s1168_s21 = smul.f32 0.001953125, %s3984_s20 }
 0x2f1   : > { %s1169_s22 = sadd.f32 0.00390625, %s1168_s21 }
 0x2f3   : > { %v1170_v2 = vstv %s1169_s22 }
 0x2f4   : > { %4008 = vrsqrt.f32 %v1170_v2 }
 0x2fe   : > { %v4009_v5 = vpop.eup %4008 }
 0x2ff   : > { %3985 = vpush %v4009_v5 }
 0x330   : > { %s3986_s29 = spop %3985 }
 0x331   : > { %v1173_v16 = vstv %s3986_s29 }
 0x332   : > { %v1174_v20 = vmul.f32 %v1173_v16, %v4283_v45  ;;  %v1175_v21 = vmul.f32 %v1173_v16, %v4285_v46  ;;  %v1176_v22 = vmul.f32 %v1173_v16, %v4287_v47  ;;  %v1177_v25 = vmul.f32 %v1173_v16, %v4289_v48 }
 0x333   : > { %v1178_v45 = vmul.f32 %v1173_v16, %v4291_v49  ;;  %v1179_v46 = vmul.f32 %v1173_v16, %v4297_v55  ;;  %v1180_v47 = vmul.f32 %v1173_v16, %v4303_v57  ;;  %v1181_v48 = vmul.f32 %v1173_v16, %v4310_v0  ;;  %v1064_v0 = vld [vmem:[%s5072_s4 + $0x28] sm:$0xff] }
 0x334   : > { %v1182_v49 = vmul.f32 %v1173_v16, %v4317_v8  ;;  %v1183_v55 = vmul.f32 %v1173_v16, %v4323_v15  ;;  %v1184_v32 = vmul.f32 %v1174_v20, %v1049_v6  ;;  %v1185_v57 = vmul.f32 %v1175_v21, %v1050_v7  ;;  %v1067_v15 = vld [vmem:[%s5072_s4 + $0x40] sm:$0xff] }
 0x335   : > { %v1186_v35 = vmul.f32 %v1176_v22, %v1051_v9  ;;  %v1187_v36 = vmul.f32 %v1177_v25, %v1052_v10  ;;  %v1188_v37 = vmul.f32 %v1178_v45, %v1053_v11  ;;  %v1189_v8 = vmul.f32 %v1179_v46, %v1054_v12 }
 0x336   : > { %v1190_v39 = vmul.f32 %v1180_v47, %v1055_v17  ;;  %v1191_v40 = vmul.f32 %v1181_v48, %v1056_v18  ;;  %v1192_v41 = vmul.f32 %v1182_v49, %v1057_v19  ;;  %v1193_v42 = vmul.f32 %v1183_v55, %v1058_v26 }
 0x337   : > { %v1194_v43 = vadd.f32 %v1184_v32, %v1059_v27  ;;  %v1195_v44 = vadd.f32 %v1185_v57, %v1060_v28  ;;  %v1196_v50 = vadd.f32 %v1186_v35, %v1061_v29  ;;  %v1197_v51 = vadd.f32 %v1187_v36, %v1062_v30 }
 0x338   : > { %v1198_v56 = vadd.f32 %v1188_v37, %v1063_v31  ;;  %v1199_v54 = vadd.f32 %v1189_v8, %v1064_v0  ;;  %v1200_v58 = vadd.f32 %v1190_v39, %v1065_v33  ;;  %v1201_v62 = vadd.f32 %v1191_v40, %v1066_v34  ;;  %v3375_v31 = vld [vmem:[%s5073_s5 + $0x20] sm:$0xff]  ;;  %v3386_v40 = vld [vmem:[%s5073_s5 + $0x28] sm:$0xff] }
 0x339   : > { %v1202_v63 = vadd.f32 %v1192_v41, %v1067_v15  ;;  %v1203_v2 = vadd.f32 %v1193_v42, %v1068_v38  ;;  %v1204_v5 = vmax.f32 %v1194_v43, 0.0  ;;  %v1205_v6 = vmax.f32 %v1195_v44, 0.0  ;;  %v1247_v8 = vld [vmem:[#allocation2] sm:$0xff] }
 0x33a   : > { %v1206_v7 = vmax.f32 %v1196_v50, 0.0  ;;  %v1207_v9 = vmax.f32 %v1197_v51, 0.0  ;;  %v1208_v10 = vmax.f32 %v1198_v56, 0.0  ;;  %v1209_v11 = vmax.f32 %v1199_v54, 0.0 }
 0x33b   : > { %v1210_v12 = vmax.f32 %v1200_v58, 0.0  ;;  %v1211_v16 = vmax.f32 %v1201_v62, 0.0  ;;  %v1212_v17 = vmax.f32 %v1202_v63, 0.0  ;;  %v1213_v18 = vmax.f32 %v1203_v2, 0.0  ;;  %v3397_v2 = vld [vmem:[%s5073_s5 + $0x30] sm:$0xff] }
 0x33c   : > { %v1214_v19 = vmul.f32 %v1204_v5, %v4221_v53  ;;  %v1215_v20 = vmul.f32 %v1205_v6, %v4216_v52  ;;  %v1216_v21 = vmul.f32 %v1206_v7, %v4234_v60  ;;  %v1217_v22 = vmul.f32 %v1207_v9, %v4229_v59 }
 0x33d   : > { %v1218_v25 = vmul.f32 %v1208_v10, %v4247_v4  ;;  %v1219_v26 = vmul.f32 %v1209_v11, %v4242_v3  ;;  %v1220_v27 = vmul.f32 %v1210_v12, %v4261_v14  ;;  %v1221_v28 = vmul.f32 %v1211_v16, %v4256_v13 }
 0x33e   : > { %v1222_v45 = vmul.f32 %v1212_v17, %v4275_v24  ;;  %v1223_v46 = vmul.f32 %v1213_v18, %v4270_v23  ;;  %1237 = vst.msk [vmem:[#allocation2 + $0xb] sm:$0xff] %vm1079_vm1, %v1214_v19  ;;  %1238 = vst.msk [vmem:[#allocation2 + $0x13] sm:$0xff] %vm1079_vm1, %v1215_v20  ;;  %v3408_v19 = vld [vmem:[%s5073_s5 + $0x38] sm:$0xff] }
 0x33f   : > { %1239 = vst.msk [vmem:[#allocation2 + $0x1b] sm:$0xff] %vm1079_vm1, %v1216_v21  ;;  %1240 = vst.msk [vmem:[#allocation2 + $0x23] sm:$0xff] %vm1079_vm1, %v1217_v22 }
 0x340   : > { %1241 = vst.msk [vmem:[#allocation2 + $0x2b] sm:$0xff] %vm1079_vm1, %v1218_v25  ;;  %1242 = vst.msk [vmem:[#allocation2 + $0x33] sm:$0xff] %vm1079_vm1, %v1219_v26 }
 0x341   : > { %1243 = vst.msk [vmem:[#allocation2 + $0x3b] sm:$0xff] %vm1079_vm1, %v1220_v27  ;;  %1244 = vst.msk [vmem:[#allocation2 + $0x43] sm:$0xff] %vm1079_vm1, %v1221_v28 }
 0x342   : > { %1245 = vst.msk [vmem:[#allocation2 + $0x4b] sm:$0xff] %vm1079_vm1, %v1222_v45  ;;  %1246 = vst.msk [vmem:[#allocation2 + $0x53] sm:$0xff] %vm1079_vm1, %v1223_v46  ;;  %v3419_v46 = vld [vmem:[%s5073_s5 + $0x40] sm:$0xff] }
 0x345   : > { %v1259_v47 = vld [vmem:[#allocation2 + $0x9] sm:$0xff]  ;;  %v1260_v29 = vld [vmem:[#allocation2 + $0x11] sm:$0xff] }
 0x346   : > { %v1561_v48 = vld [vmem:[#allocation2 + $0xa] sm:$0xff]  ;;  %3680 = vmatmul.mubr.msk.f32.vlgmr.msra.gmra.mrb[10].mxu0 %vm1079_vm1, %v1259_v47  ;;  %v1562_v30 = vld [vmem:[#allocation2 + $0x12] sm:$0xff]  ;;  %v1563_v55 = vld [vmem:[#allocation2 + $0x1a] sm:$0xff] }
 0x347   : > { %3714 = vmatmul.mubr.msk.f32.vlgmr.msra.gmra.mrb[0].mxu1 %vm1079_vm1, %v1561_v48  ;;  %3682 = vmatprep.mubr.msk.f32.mxu0 %vm1079_vm1, %v1260_v29  ;;  %v1261_v49 = vld [vmem:[#allocation2 + $0x19] sm:$0xff]  ;;  %v1262_v32 = vld [vmem:[#allocation2 + $0x21] sm:$0xff]  ;;  %v1565_v0 = vld [vmem:[#allocation2 + $0x2a] sm:$0xff] }
 0x348   : > { %3729 = vmatpush3.msra.mxu1 %v4365_v61  ;;  %3716 = vmatprep.mubr.msk.f32.mxu1 %vm1079_vm1, %v1562_v30  ;;  %v1564_v57 = vld [vmem:[#allocation2 + $0x22] sm:$0xff]  ;;  %v1566_v33 = vld [vmem:[#allocation2 + $0x32] sm:$0xff]  ;;  %v1567_v35 = vld [vmem:[#allocation2 + $0x3a] sm:$0xff] }
 0x349   : > { %3695 = vmatpush3.msra.mxu0 %v4373_v1  ;;  %3745 = vmatprep.subr.mxu1 %v3375_v31  ;;  %v1263_v61 = vld [vmem:[#allocation2 + $0x29] sm:$0xff]  ;;  %v1264_v1 = vld [vmem:[#allocation2 + $0x31] sm:$0xff]  ;;  %v1265_v34 = vld [vmem:[#allocation2 + $0x39] sm:$0xff] }
 0x34a   : > { %3683 = vmatmul.mubr.msk.f32.gmra.mrb[12].mxu0 %vm1079_vm1, %v1261_v49  ;;  %v1266_v36 = vld [vmem:[#allocation2 + $0x41] sm:$0xff]  ;;  %v1267_v15 = vld [vmem:[#allocation2 + $0x49] sm:$0xff]  ;;  %v1250_v42 = vld [vmem:[#allocation2 + $0x18] sm:$0xff] }
 0x34b   : > { %3717 = vmatmul.mubr.msk.f32.gmra.mrb[2].mxu1 %vm1079_vm1, %v1563_v55  ;;  %3685 = vmatprep.mubr.msk.f32.mxu0 %vm1079_vm1, %v1262_v32  ;;  %v1568_v37 = vld [vmem:[#allocation2 + $0x42] sm:$0xff]  ;;  %v1569_v38 = vld [vmem:[#allocation2 + $0x4a] sm:$0xff]  ;;  %v1254_v51 = vld [vmem:[#allocation2 + $0x38] sm:$0xff] }
 0x34c   : > { %3719 = vmatprep.mubr.msk.f32.mxu1 %vm1079_vm1, %v1564_v57  ;;  %v1248_v39 = vld [vmem:[#allocation2 + $0x8] sm:$0xff]  ;;  %v1249_v41 = vld [vmem:[#allocation2 + $0x10] sm:$0xff]  ;;  %v1251_v43 = vld [vmem:[#allocation2 + $0x20] sm:$0xff] }
 0x34d   : > { %v1252_v44 = vld [vmem:[#allocation2 + $0x28] sm:$0xff]  ;;  %v1253_v50 = vld [vmem:[#allocation2 + $0x30] sm:$0xff]  ;;  %v1255_v56 = vld [vmem:[#allocation2 + $0x40] sm:$0xff] }
 0x34e   : > { %3686 = vmatmul.mubr.msk.f32.gmra.mrb[14].mxu0 %vm1079_vm1, %v1263_v61  ;;  %v1256_v54 = vld [vmem:[#allocation2 + $0x48] sm:$0xff]  ;;  %v1736_v58 = vld [vmem:[#allocation2 + $0x52] sm:$0xff]  ;;  %v1896_v5 = vld [vmem:[#allocation2 + $0x1b] sm:$0xff] }
 0x34f   : > { %3720 = vmatmul.mubr.msk.f32.gmra.mrb[4].mxu1 %vm1079_vm1, %v1565_v0  ;;  %3688 = vmatprep.mubr.msk.f32.mxu0 %vm1079_vm1, %v1264_v1  ;;  %v1894_v62 = vld [vmem:[#allocation2 + $0xb] sm:$0xff]  ;;  %v1895_v63 = vld [vmem:[#allocation2 + $0x13] sm:$0xff]  ;;  %v1897_v6 = vld [vmem:[#allocation2 + $0x23] sm:$0xff] }
 0x350   : > { %3722 = vmatprep.mubr.msk.f32.mxu1 %vm1079_vm1, %v1566_v33  ;;  %v1898_v7 = vld [vmem:[#allocation2 + $0x2b] sm:$0xff]  ;;  %v1899_v9 = vld [vmem:[#allocation2 + $0x33] sm:$0xff]  ;;  %v1900_v10 = vld [vmem:[#allocation2 + $0x3b] sm:$0xff] }
 0x351   : > { %v1901_v11 = vld [vmem:[#allocation2 + $0x43] sm:$0xff]  ;;  %v1902_v12 = vld [vmem:[#allocation2 + $0x4b] sm:$0xff]  ;;  %v1903_v16 = vld [vmem:[#allocation2 + $0x53] sm:$0xff] }
 0x352   : > { %3689 = vmatmul.mubr.msk.f32.gmra.mrb[16].mxu0 %vm1079_vm1, %v1265_v34  ;;  %v2061_v17 = vld [vmem:[#allocation2 + $0xc] sm:$0xff]  ;;  %v2062_v18 = vld [vmem:[#allocation2 + $0x14] sm:$0xff]  ;;  %v2063_v20 = vld [vmem:[#allocation2 + $0x1c] sm:$0xff] }
 0x353   : > { %3723 = vmatmul.mubr.msk.f32.gmra.mrb[6].mxu1 %vm1079_vm1, %v1567_v35  ;;  %3691 = vmatprep.mubr.msk.f32.mxu0 %vm1079_vm1, %v1266_v36  ;;  %v2064_v21 = vld [vmem:[#allocation2 + $0x24] sm:$0xff]  ;;  %v2065_v22 = vld [vmem:[#allocation2 + $0x2c] sm:$0xff]  ;;  %v2066_v25 = vld [vmem:[#allocation2 + $0x34] sm:$0xff] }
 0x354   : > { %3725 = vmatprep.mubr.msk.f32.mxu1 %vm1079_vm1, %v1568_v37  ;;  %v2067_v26 = vld [vmem:[#allocation2 + $0x3c] sm:$0xff]  ;;  %v2068_v27 = vld [vmem:[#allocation2 + $0x44] sm:$0xff]  ;;  %v2069_v28 = vld [vmem:[#allocation2 + $0x4c] sm:$0xff] }
 0x355   : > { %v2070_v45 = vld [vmem:[#allocation2 + $0x54] sm:$0xff]  ;;  %v2237_v47 = vld [vmem:[#allocation2 + $0x5c] sm:$0xff]  ;;  %v2401_v32 = vld [vmem:[#allocation2 + $0x45] sm:$0xff] }
 0x356   : > { %3692 = vmatmul.mubr.msk.f32.gmra.mrb[18].mxu0 %vm1079_vm1, %v1267_v15  ;;  %v2396_v29 = vld [vmem:[#allocation2 + $0x1d] sm:$0xff]  ;;  %v2399_v49 = vld [vmem:[#allocation2 + $0x35] sm:$0xff]  ;;  %v2564_v34 = vld [vmem:[#allocation2 + $0x26] sm:$0xff] }
 0x357   : > { %3726 = vmatmul.mubr.msk.f32.gmra.mrb[8].mxu1 %vm1079_vm1, %v1569_v38  ;;  %3696 = vmatprep.mubr.msk.f32.mxu0 %vm1079_vm1, %v1247_v8  ;;  %v2403_v61 = vld [vmem:[#allocation2 + $0x55] sm:$0xff]  ;;  %v2568_v8 = vld [vmem:[#allocation2 + $0x46] sm:$0xff] }
 0x358   : > { %3730 = vmatprep.mubr.msk.f32.mxu1 %vm1079_vm1, %v1561_v48  ;;  %v2395_v48 = vld [vmem:[#allocation2 + $0x15] sm:$0xff] }
 0x359   : > { %v2562_v1 = vld [vmem:[#allocation2 + $0x16] sm:$0xff]  ;;  %v2569_v15 = vld [vmem:[#allocation2 + $0x4e] sm:$0xff] }
 0x35a   : > { %3697 = vmatmul.mubr.msk.f32.vlgmr.msra.gmra.mrb[10].mxu0 %vm1079_vm1, %v1248_v39  ;;  %v2566_v36 = vld [vmem:[#allocation2 + $0x36] sm:$0xff]  ;;  %v2571_v39 = vld [vmem:[#allocation2 + $0x5e] sm:$0xff] }
 0x35b   : > { %3731 = vmatmul.mubr.msk.f32.vlgmr.msra.gmra.mrb[0].mxu1 %vm1079_vm1, %v1562_v30  ;;  %3699 = vmatprep.mubr.msk.f32.mxu0 %vm1079_vm1, %v1249_v41  ;;  %v2397_v30 = vld [vmem:[#allocation2 + $0x25] sm:$0xff] }
 0x35c   : > { %3746 = vmatpush3.msra.mxu1 %v3375_v31  ;;  %3733 = vmatprep.mubr.msk.f32.mxu1 %vm1079_vm1, %v1563_v55  ;;  %v2398_v31 = vld [vmem:[#allocation2 + $0x2d] sm:$0xff]  ;;  %v2400_v55 = vld [vmem:[#allocation2 + $0x3d] sm:$0xff] }
 0x35d   : > { %3762 = vmatprep.subr.mxu1 %v3386_v40  ;;  %v2894_v41 = vld [vmem:[%s5076_s8 + $0x8] sm:$0xff] }
 0x35e   : > { %3700 = vmatmul.mubr.msk.f32.gmra.mrb[12].mxu0 %vm1079_vm1, %v1250_v42  ;;  %v2883_v42 = vld [vmem:[%s4125_s15] sm:$0xff] }
 0x35f   : > { %3734 = vmatmul.mubr.msk.f32.gmra.mrb[2].mxu1 %vm1079_vm1, %v1564_v57  ;;  %3702 = vmatprep.mubr.msk.f32.mxu0 %vm1079_vm1, %v1251_v43  ;;  %v2402_v57 = vld [vmem:[#allocation2 + $0x4d] sm:$0xff] }
 0x360   : > { %3736 = vmatprep.mubr.msk.f32.mxu1 %vm1079_vm1, %v1565_v0  ;;  %v2404_v0 = vld [vmem:[#allocation2 + $0x5d] sm:$0xff] }
 0x362   : > { %3703 = vmatmul.mubr.msk.f32.gmra.mrb[14].mxu0 %vm1079_vm1, %v1252_v44 }
 0x363   : > { %3737 = vmatmul.mubr.msk.f32.gmra.mrb[4].mxu1 %vm1079_vm1, %v1566_v33  ;;  %3705 = vmatprep.mubr.msk.f32.mxu0 %vm1079_vm1, %v1253_v50  ;;  %v2563_v33 = vld [vmem:[#allocation2 + $0x1e] sm:$0xff] }
 0x364   : > { %3739 = vmatprep.mubr.msk.f32.mxu1 %vm1079_vm1, %v1567_v35  ;;  %v2565_v35 = vld [vmem:[#allocation2 + $0x2e] sm:$0xff] }
 0x366   : > { %3706 = vmatmul.mubr.msk.f32.gmra.mrb[16].mxu0 %vm1079_vm1, %v1254_v51  ;;  %v2884_v51 = vld [vmem:[%s4125_s15 + $0x8] sm:$0xff] }
 0x367   : > { %3740 = vmatmul.mubr.msk.f32.gmra.mrb[6].mxu1 %vm1079_vm1, %v1568_v37  ;;  %3708 = vmatprep.mubr.msk.f32.mxu0 %vm1079_vm1, %v1255_v56  ;;  %v2567_v37 = vld [vmem:[#allocation2 + $0x3e] sm:$0xff] }
 0x368   : > { %3742 = vmatprep.mubr.msk.f32.mxu1 %vm1079_vm1, %v1569_v38  ;;  %v2570_v38 = vld [vmem:[#allocation2 + $0x56] sm:$0xff] }
 0x36a   : > { %3709 = vmatmul.mubr.msk.f32.gmra.mrb[18].mxu0 %vm1079_vm1, %v1256_v54  ;;  %v2885_v54 = vld [vmem:[%s4125_s15 + $0x10] sm:$0xff] }
 0x36b   : > { %3743 = vmatmul.mubr.msk.f32.gmra.mrb[8].mxu1 %vm1079_vm1, %v1736_v58  ;;  %3834 = vmatprep.mubr.msk.f32.mxu0 %vm422_vm0, %v2883_v42 }
 0x36c   : > { %3747 = vmatprep.mubr.msk.f32.mxu1 %vm1079_vm1, %v1894_v62  ;;  %v2886_v62 = vld [vmem:[%s4125_s15 + $0x18] sm:$0xff] }
 0x36f   : > { %3748 = vmatmul.mubr.msk.f32.vlgmr.msra.gmra.mrb[0].mxu1 %vm1079_vm1, %v1895_v63 }
 0x370   : > { %3763 = vmatpush3.msra.mxu1 %v3386_v40  ;;  %3750 = vmatprep.mubr.msk.f32.mxu1 %vm1079_vm1, %v1896_v5  ;;  %v2893_v40 = vld [vmem:[%s5076_s8] sm:$0xff] }
 0x371   : > { %3779 = vmatprep.subr.mxu1 %v3397_v2  ;;  %v3865_v44 = vpack.c.bf16 %v2894_v41, %v2893_v40 }
 0x373   : > { %3751 = vmatmul.mubr.msk.f32.gmra.mrb[2].mxu1 %vm1079_vm1, %v1897_v6  ;;  %3866 = vmatprep.subr.bf16.mxu0 %v3865_v44  ;;  %v2888_v6 = vld [vmem:[%s4125_s15 + $0x28] sm:$0xff] }
 0x374   : > { %3753 = vmatprep.mubr.msk.f32.mxu1 %vm1079_vm1, %v1898_v7  ;;  %3868 = vmatpush3.bf16.msra.mxu0 %v3865_v44 }
 0x377   : > { %3754 = vmatmul.mubr.msk.f32.gmra.mrb[4].mxu1 %vm1079_vm1, %v1899_v9  ;;  %3835 = vmatmul.mubr.msk.f32.vlgmr.msra.gmra.mrb[20].mxu0 %vm422_vm0, %v2884_v51  ;;  %v2889_v9 = vld [vmem:[%s4125_s15 + $0x30] sm:$0xff] }
 0x378   : > { %3756 = vmatprep.mubr.msk.f32.mxu1 %vm1079_vm1, %v1900_v10  ;;  %3837 = vmatprep.mubr.msk.f32.mxu0 %vm422_vm0, %v2885_v54 }
 0x37b   : > { %3757 = vmatmul.mubr.msk.f32.gmra.mrb[6].mxu1 %vm1079_vm1, %v1901_v11  ;;  %3838 = vmatmul.mubr.msk.f32.gmra.mrb[22].mxu0 %vm422_vm0, %v2886_v62  ;;  %v2890_v11 = vld [vmem:[%s4125_s15 + $0x38] sm:$0xff] }
 0x37c   : > { %3759 = vmatprep.mubr.msk.f32.mxu1 %vm1079_vm1, %v1902_v12 }
 0x37f   : > { %3760 = vmatmul.mubr.msk.f32.gmra.mrb[8].mxu1 %vm1079_vm1, %v1903_v16  ;;  %v2891_v16 = vld [vmem:[%s4125_s15 + $0x40] sm:$0xff] }
 0x380   : > { %3764 = vmatprep.mubr.msk.f32.mxu1 %vm1079_vm1, %v2061_v17 }
 0x383   : > { %3765 = vmatmul.mubr.msk.f32.vlgmr.msra.gmra.mrb[0].mxu1 %vm1079_vm1, %v2062_v18 }
 0x384   : > { %3780 = vmatpush3.msra.mxu1 %v3397_v2  ;;  %3767 = vmatprep.mubr.msk.f32.mxu1 %vm1079_vm1, %v2063_v20  ;;  %v2887_v2 = vld [vmem:[%s4125_s15 + $0x20] sm:$0xff] }
 0x385   : > { %3796 = vmatprep.subr.mxu1 %v3408_v19  ;;  %3840 = vmatprep.mubr.msk.f32.mxu0 %vm422_vm0, %v2887_v2 }
 0x386   : > { %3841 = vmatmul.mubr.msk.f32.gmra.mrb[24].mxu0 %vm422_vm0, %v2888_v6 }
 0x387   : > { %3768 = vmatmul.mubr.msk.f32.gmra.mrb[2].mxu1 %vm1079_vm1, %v2064_v21  ;;  %3843 = vmatprep.mubr.msk.f32.mxu0 %vm422_vm0, %v2889_v9 }
 0x388   : > { %3770 = vmatprep.mubr.msk.f32.mxu1 %vm1079_vm1, %v2065_v22 }
 0x38a   : > { %3844 = vmatmul.mubr.msk.f32.gmra.mrb[26].mxu0 %vm422_vm0, %v2890_v11 }
 0x38b   : > { %3771 = vmatmul.mubr.msk.f32.gmra.mrb[4].mxu1 %vm1079_vm1, %v2066_v25  ;;  %3846 = vmatprep.mubr.msk.f32.mxu0 %vm422_vm0, %v2891_v16 }
 0x38c   : > { %3773 = vmatprep.mubr.msk.f32.mxu1 %vm1079_vm1, %v2067_v26 }
 0x38f   : > { %3774 = vmatmul.mubr.msk.f32.gmra.mrb[6].mxu1 %vm1079_vm1, %v2068_v27 }
 0x390   : > { %3776 = vmatprep.mubr.msk.f32.mxu1 %vm1079_vm1, %v2069_v28 }
 0x393   : > { %3777 = vmatmul.mubr.msk.f32.gmra.mrb[8].mxu1 %vm1079_vm1, %v2070_v45 }
 0x394   : > { %3781 = vmatprep.mubr.msk.f32.mxu1 %vm1079_vm1, %v2062_v18  ;;  %v2892_v18 = vld [vmem:[%s4125_s15 + $0x48] sm:$0xff] }
 0x395   : > { %3847 = vmatmul.mubr.msk.f32.gmra.mrb[28].mxu0 %vm422_vm0, %v2892_v18 }
 0x397   : > { %3782 = vmatmul.mubr.msk.f32.vlgmr.msra.gmra.mrb[0].mxu1 %vm1079_vm1, %v2063_v20 }
 0x398   : > { %3797 = vmatpush3.msra.mxu1 %v3408_v19  ;;  %3784 = vmatprep.mubr.msk.f32.mxu1 %vm1079_vm1, %v2064_v21 }
 0x399   : > { %3813 = vmatprep.subr.mxu1 %v3419_v46 }
 0x39b   : > { %3785 = vmatmul.mubr.msk.f32.gmra.mrb[2].mxu1 %vm1079_vm1, %v2065_v22 }
 0x39c   : > { %3787 = vmatprep.mubr.msk.f32.mxu1 %vm1079_vm1, %v2066_v25 }
 0x39f   : > { %3788 = vmatmul.mubr.msk.f32.gmra.mrb[4].mxu1 %vm1079_vm1, %v2067_v26 }
 0x3a0   : > { %3790 = vmatprep.mubr.msk.f32.mxu1 %vm1079_vm1, %v2068_v27 }
 0x3a3   : > { %3791 = vmatmul.mubr.msk.f32.gmra.mrb[6].mxu1 %vm1079_vm1, %v2069_v28 }
 0x3a4   : > { %3793 = vmatprep.mubr.msk.f32.mxu1 %vm1079_vm1, %v2070_v45 }
 0x3a7   : > { %3794 = vmatmul.mubr.msk.f32.gmra.mrb[8].mxu1 %vm1079_vm1, %v2237_v47 }
 0x3a8   : > { %3798 = vmatprep.mubr.msk.f32.mxu1 %vm1079_vm1, %v2395_v48 }
 0x3ab   : > { %3799 = vmatmul.mubr.msk.f32.vlgmr.msra.gmra.mrb[0].mxu1 %vm1079_vm1, %v2396_v29 }
 0x3ac   : > { %3814 = vmatpush3.msra.mxu1 %v3419_v46  ;;  %3801 = vmatprep.mubr.msk.f32.mxu1 %vm1079_vm1, %v2397_v30 }
 0x3af   : > { %3802 = vmatmul.mubr.msk.f32.gmra.mrb[2].mxu1 %vm1079_vm1, %v2398_v31 }
 0x3b0   : > { %3804 = vmatprep.mubr.msk.f32.mxu1 %vm1079_vm1, %v2399_v49 }
 0x3b3   : > { %3805 = vmatmul.mubr.msk.f32.gmra.mrb[4].mxu1 %vm1079_vm1, %v2400_v55 }
 0x3b4   : > { %3807 = vmatprep.mubr.msk.f32.mxu1 %vm1079_vm1, %v2401_v32 }
 0x3b7   : > { %3808 = vmatmul.mubr.msk.f32.gmra.mrb[6].mxu1 %vm1079_vm1, %v2402_v57 }
 0x3b8   : > { %3810 = vmatprep.mubr.msk.f32.mxu1 %vm1079_vm1, %v2403_v61 }
 0x3bb   : > { %3811 = vmatmul.mubr.msk.f32.gmra.mrb[8].mxu1 %vm1079_vm1, %v2404_v0 }
 0x3bc   : > { %3815 = vmatprep.mubr.msk.f32.mxu1 %vm1079_vm1, %v2562_v1 }
 0x3bf   : > { %3816 = vmatmul.mubr.msk.f32.vlgmr.msra.gmra.mrb[0].mxu1 %vm1079_vm1, %v2563_v33 }
 0x3c0   : > { %3818 = vmatprep.mubr.msk.f32.mxu1 %vm1079_vm1, %v2564_v34 }
 0x3c3   : > { %3819 = vmatmul.mubr.msk.f32.gmra.mrb[2].mxu1 %vm1079_vm1, %v2565_v35 }
 0x3c4   : > { %3821 = vmatprep.mubr.msk.f32.mxu1 %vm1079_vm1, %v2566_v36 }
 0x3c7   : > { %3822 = vmatmul.mubr.msk.f32.gmra.mrb[4].mxu1 %vm1079_vm1, %v2567_v37 }
 0x3c8   : > { %3824 = vmatprep.mubr.msk.f32.mxu1 %vm1079_vm1, %v2568_v8 }
 0x3cb   : > { %3825 = vmatmul.mubr.msk.f32.gmra.mrb[6].mxu1 %vm1079_vm1, %v2569_v15 }
 0x3cc   : > { %3827 = vmatprep.mubr.msk.f32.mxu1 %vm1079_vm1, %v2570_v38 }
 0x3cf   : > { %3828 = vmatmul.mubr.msk.f32.gmra.mrb[8].mxu1 %vm1079_vm1, %v2571_v39 }
 0x42d   : > { %v3698_v43 = vpop.f32.mrb[10].mxu0 }
 0x42e   : > { %v1511_v50 = vpop.f32.mrb[11].mxu0 }
 0x431   : > { %v3701_v56 = vpop.f32.mrb[12].mxu0 }
 0x432   : > { %v1521_v58 = vpop.f32.mrb[13].mxu0 }
 0x435   : > { %v3704_v63 = vpop.f32.mrb[14].mxu0 }
 0x436   : > { %v1531_v5 = vpop.f32.mrb[15].mxu0 }
 0x439   : > { %v3707_v7 = vpop.f32.mrb[16].mxu0 }
 0x43a   : > { %v1541_v10 = vpop.f32.mrb[17].mxu0 }
 0x43d   : > { %v3710_v12 = vpop.f32.mrb[18].mxu0 }
 0x43e   : > { %v1551_v17 = vpop.f32.mrb[19].mxu0 }
 0x44a   : > { %v4647_v11 = vpop.f32.mrb[20].mxu0 }
 0x44b   : > { %v4651_v16 = vpop.f32.mrb[21].mxu0 }
 0x44e   : > { %v4655_v18 = vpop.f32.mrb[22].mxu0 }
 0x492   : > { %v3817_v19 = vpop.f32.mrb[0].mxu1 }
 0x493   : > { %v4597_v20 = vadd.f32 %v3817_v19, %v3698_v43  ;;  %v2670_v21 = vpop.f32.mrb[1].mxu1 }
 0x494   : > { %v4599_v22 = vadd.f32 %v2670_v21, %v1511_v50  ;;  %v3063_v21 = vmul.f32 %v4655_v18, %v4229_v59 }
 0x495   : > { %v2750_v25 = vmul.f32 %v4597_v20, %v4216_v52 }
 0x496   : > { %v2749_v26 = vmul.f32 %v4599_v22, %v4221_v53  ;;  %v3820_v27 = vpop.f32.mrb[2].mxu1 }
 0x497   : > { %v4605_v28 = vadd.f32 %v3820_v27, %v3701_v56  ;;  %v2680_v45 = vpop.f32.mrb[3].mxu1  ;;  %v2760_v46 = vsel %vm1079_vm1, %v2750_v25, 0.0  ;;  %v4660_v25 = vpop.f32.mrb[23].mxu0 }
 0x498   : > { %v2759_v47 = vsel %vm1079_vm1, %v2749_v26, 0.0  ;;  %v4609_v48 = vadd.f32 %v2680_v45, %v1521_v58  ;;  %v3062_v27 = vmul.f32 %v4660_v25, %v4234_v60 }
 0x499   : > { %v2752_v29 = vmul.f32 %v4605_v28, %v4229_v59  ;;  %v2761_v49 = vadd.f32 %v2760_v46, %v2759_v47 }
 0x49a   : > { %v2751_v30 = vmul.f32 %v4609_v48, %v4234_v60  ;;  %v3823_v31 = vpop.f32.mrb[4].mxu1  ;;  %v3073_v47 = vsel %vm1079_vm1, %v3062_v27, 0.0 }
 0x49b   : > { %v4615_v55 = vadd.f32 %v3823_v31, %v3704_v63  ;;  %v2690_v32 = vpop.f32.mrb[5].mxu1  ;;  %v2764_v1 = vsel %vm1079_vm1, %v2752_v29, 0.0 }
 0x49c   : > { %v2762_v57 = vsel %vm1079_vm1, %v2751_v30, 0.0  ;;  %v4618_v61 = vadd.f32 %v2690_v32, %v1531_v5 }
 0x49d   : > { %v2763_v0 = vadd.f32 %v2762_v57, %v2761_v49  ;;  %v2754_v33 = vmul.f32 %v4615_v55, %v4242_v3 }
 0x49e   : > { %v2753_v34 = vmul.f32 %v4618_v61, %v4247_v4  ;;  %v3826_v35 = vpop.f32.mrb[6].mxu1 }
 0x49f   : > { %v2765_v36 = vadd.f32 %v2764_v1, %v2763_v0  ;;  %v4625_v37 = vadd.f32 %v3826_v35, %v3707_v7  ;;  %v2700_v8 = vpop.f32.mrb[7].mxu1  ;;  %v2768_v40 = vsel %vm1079_vm1, %v2754_v33, 0.0 }
 0x4a0   : > { %v2766_v15 = vsel %vm1079_vm1, %v2753_v34, 0.0  ;;  %v4628_v38 = vadd.f32 %v2700_v8, %v1541_v10 }
 0x4a1   : > { %v2767_v39 = vadd.f32 %v2766_v15, %v2765_v36  ;;  %v2756_v41 = vmul.f32 %v4625_v37, %v4256_v13 }
 0x4a2   : > { %v2755_v42 = vmul.f32 %v4628_v38, %v4261_v14  ;;  %v3829_v43 = vpop.f32.mrb[8].mxu1 }
 0x4a3   : > { %v2769_v44 = vadd.f32 %v2768_v40, %v2767_v39  ;;  %v4635_v50 = vadd.f32 %v3829_v43, %v3710_v12  ;;  %v2710_v51 = vpop.f32.mrb[9].mxu1  ;;  %v2772_v62 = vsel %vm1079_vm1, %v2756_v41, 0.0  ;;  %v3061_v12 = vmul.f32 %v4647_v11, %v4216_v52  ;;  %v4665_v52 = vpop.f32.mrb[24].mxu0 }
 0x4a4   : > { %v2770_v56 = vsel %vm1079_vm1, %v2755_v42, 0.0  ;;  %v4638_v54 = vadd.f32 %v2710_v51, %v1551_v17  ;;  %v3060_v17 = vmul.f32 %v4651_v16, %v4221_v53  ;;  %v4667_v46 = vpop.f32.mrb[25].mxu0  ;;  %v3075_v53 = vsel %vm1079_vm1, %v3063_v21, 0.0 }
 0x4a5   : > { %v2771_v58 = vadd.f32 %v2770_v56, %v2769_v44  ;;  %v2758_v63 = vmul.f32 %v4635_v50, %v4270_v23  ;;  %v3071_v19 = vsel %vm1079_vm1, %v3061_v12, 0.0  ;;  %v3065_v29 = vmul.f32 %v4665_v52, %v4242_v3  ;;  %v4675_v30 = vpop.f32.mrb[26].mxu0  ;;  %v4731_v12 = vld [vmem:[%s5069_s1] sm:$0xff] }
 0x4a6   : > { %v2757_v2 = vmul.f32 %v4638_v54, %v4275_v24  ;;  %v3070_v26 = vsel %vm1079_vm1, %v3060_v17, 0.0  ;;  %v3064_v59 = vmul.f32 %v4667_v46, %v4247_v4  ;;  %v4677_v49 = vpop.f32.mrb[27].mxu0  ;;  %v3067_v4 = vmul.f32 %v4675_v30, %v4256_v13  ;;  %v4737_v17 = vld [vmem:[%s5069_s1 + $0x8] sm:$0xff] }
 0x4a7   : > { %v2773_v5 = vadd.f32 %v2772_v62, %v2771_v58  ;;  %v2776_v9 = vsel %vm1079_vm1, %v2758_v63, 0.0  ;;  %v3072_v45 = vadd.f32 %v3071_v19, %v3070_v26  ;;  %v3066_v32 = vmul.f32 %v4677_v49, %v4261_v14  ;;  %v4682_v57 = vpop.f32.mrb[28].mxu0 }
 0x4a8   : > { %v2774_v6 = vsel %vm1079_vm1, %v2757_v2, 0.0  ;;  %v3077_v60 = vsel %vm1079_vm1, %v3064_v59, 0.0  ;;  %v4684_v1 = vpop.f32.mrb[29].mxu0  ;;  %v3079_v3 = vsel %vm1079_vm1, %v3065_v29, 0.0  ;;  %v3083_v8 = vsel %vm1079_vm1, %v3067_v4, 0.0 }
 0x4a9   : > { %v2775_v7 = vadd.f32 %v2774_v6, %v2773_v5  ;;  %v3074_v31 = vadd.f32 %v3073_v47, %v3072_v45  ;;  %v3081_v34 = vsel %vm1079_vm1, %v3066_v32, 0.0  ;;  %v3068_v35 = vmul.f32 %v4684_v1, %v4275_v24  ;;  %v4754_v45 = vld [vmem:[%s5069_s1 + $0x18] sm:$0xff] }
 0x4aa   : > { %v3069_v14 = vmul.f32 %v4682_v57, %v4270_v23 }
 0x4ab   : > { %v2777_v10 = vadd.f32 %v2776_v9, %v2775_v7  ;;  %v3076_v0 = vadd.f32 %v3075_v53, %v3074_v31  ;;  %v3085_v39 = vsel %vm1079_vm1, %v3068_v35, 0.0 }
 0x4ac   : > { %v3087_v41 = vsel %vm1079_vm1, %v3069_v14, 0.0 }
 0x4ad   : > { %2778 = vadd.xlane.f32.xlu1 %v2777_v10  ;;  %v3078_v33 = vadd.f32 %v3077_v60, %v3076_v0  ;;  %v4767_v60 = vld [vmem:[%s5069_s1 + $0x20] sm:$0xff] }
 0x4af   : > { %v3080_v36 = vadd.f32 %v3079_v3, %v3078_v33  ;;  %v4779_v33 = vld [vmem:[%s5069_s1 + $0x28] sm:$0xff] }
 0x4b1   : > { %v3082_v15 = vadd.f32 %v3081_v34, %v3080_v36 }
 0x4b3   : > { %v3084_v40 = vadd.f32 %v3083_v8, %v3082_v15 }
 0x4b5   : > { %v3086_v42 = vadd.f32 %v3085_v39, %v3084_v40 }
 0x4b7   : > { %v3088_v13 = vadd.f32 %v3087_v41, %v3086_v42  ;;  %v4797_v41 = vld [vmem:[%s5069_s1 + $0x38] sm:$0xff] }
 0x4b9   : > { %3089 = vadd.xlane.f32.xlu0 %v3088_v13 }
 0x53a   : > { %v2779_v43 = vpop.xlane.xlu1 %2778 }
 0x53b   : > { %v2780_v44 = vrot.slane %v2779_v43, 4 }
 0x53d   : > { %v2781_v51 = vadd.f32 %v2780_v44, %v2779_v43  ;;  %v4804_v44 = vld [vmem:[%s5069_s1 + $0x40] sm:$0xff] }
 0x53f   : > { %v2782_v56 = vrot.slane %v2781_v51, 2 }
 0x541   : > { %v2783_v24 = vadd.f32 %v2782_v56, %v2781_v51 }
 0x543   : > { %v2784_v58 = vrot.slane %v2783_v24, 1 }
 0x545   : > { %v2785_v62 = vadd.f32 %v2784_v58, %v2783_v24  ;;  %v4811_v58 = vld [vmem:[%s5069_s1 + $0x48] sm:$0xff] }
 0x547   : > { %3987 = vpush %v2785_v62 }
 0x578   : > { %s3988_s15 = spop %3987 }
 0x579   : > { %s2787_s30 = smul.f32 0.001953125, %s3988_s15 }
 0x57b   : > { %v2788_v23 = vstv %s2787_s30 }
 0x57c   : > { %v4698_v63 = vsub.f32 %v4599_v22, %v2788_v23  ;;  %v4701_v2 = vsub.f32 %v4597_v20, %v2788_v23  ;;  %v4704_v5 = vsub.f32 %v4609_v48, %v2788_v23  ;;  %v4707_v6 = vsub.f32 %v4605_v28, %v2788_v23 }
 0x57d   : > { %v4710_v7 = vsub.f32 %v4618_v61, %v2788_v23  ;;  %v4717_v22 = vsub.f32 %v4615_v55, %v2788_v23  ;;  %v4724_v28 = vsub.f32 %v4628_v38, %v2788_v23  ;;  %v4743_v38 = vld [vmem:[%s5069_s1 + $0x10] sm:$0xff]  ;;  %v4747_v26 = vsub.f32 %v4625_v37, %v2788_v23 }
 0x57e   : > { %v2799_v9 = vmul.f32 %v4698_v63, %v4698_v63  ;;  %v2800_v10 = vmul.f32 %v4701_v2, %v4701_v2  ;;  %v2801_v20 = vmul.f32 %v4704_v5, %v4704_v5  ;;  %v2802_v48 = vmul.f32 %v4707_v6, %v4707_v6 }
 0x57f   : > { %v2803_v61 = vmul.f32 %v4710_v7, %v4710_v7  ;;  %v2804_v27 = vmul.f32 %v4717_v22, %v4717_v22  ;;  %v4760_v31 = vsub.f32 %v4638_v54, %v2788_v23  ;;  %v2805_v37 = vmul.f32 %v4724_v28, %v4724_v28 }
 0x580   : > { %v2809_v55 = vmul.f32 %v4731_v12, %v2799_v9  ;;  %v2810_v19 = vmul.f32 %v4737_v17, %v2800_v10  ;;  %v2811_v21 = vmul.f32 %v4743_v38, %v2801_v20  ;;  %v2812_v53 = vmul.f32 %v4754_v45, %v2802_v48 }
 0x581   : > { %v2813_v32 = vmul.f32 %v4767_v60, %v2803_v61  ;;  %v4772_v4 = vsub.f32 %v4635_v50, %v2788_v23  ;;  %v2806_v54 = vmul.f32 %v4747_v26, %v4747_v26  ;;  %v2814_v34 = vmul.f32 %v4779_v33, %v2804_v27  ;;  %v4788_v50 = vld [vmem:[%s5069_s1 + $0x30] sm:$0xff] }
 0x582   : > { %v2819_v47 = vsel %vm1079_vm1, %v2809_v55, 0.0  ;;  %v2820_v29 = vsel %vm1079_vm1, %v2810_v19, 0.0  ;;  %v2822_v0 = vsel %vm1079_vm1, %v2811_v21, 0.0  ;;  %v2824_v35 = vsel %vm1079_vm1, %v2812_v53, 0.0 }
 0x583   : > { %v2821_v59 = vadd.f32 %v2820_v29, %v2819_v47  ;;  %v2807_v8 = vmul.f32 %v4760_v31, %v4760_v31  ;;  %v2815_v14 = vmul.f32 %v4788_v50, %v2805_v37  ;;  %v2826_v15 = vsel %vm1079_vm1, %v2813_v32, 0.0 }
 0x584   : > { %v2808_v40 = vmul.f32 %v4772_v4, %v4772_v4  ;;  %v2816_v42 = vmul.f32 %v4797_v41, %v2806_v54  ;;  %v2828_v13 = vsel %vm1079_vm1, %v2814_v34, 0.0 }
 0x585   : > { %v2823_v3 = vadd.f32 %v2822_v0, %v2821_v59  ;;  %v2817_v51 = vmul.f32 %v4804_v44, %v2807_v8  ;;  %v2830_v56 = vsel %vm1079_vm1, %v2815_v14, 0.0  ;;  %v3090_v59 = vpop.xlane.xlu0 %3089 }
 0x586   : > { %v2818_v62 = vmul.f32 %v4811_v58, %v2808_v40  ;;  %v2832_v23 = vsel %vm1079_vm1, %v2816_v42, 0.0  ;;  %v3091_v37 = vrot.slane %v3090_v59, 4 }
 0x587   : > { %v2825_v36 = vadd.f32 %v2824_v35, %v2823_v3  ;;  %v2834_v10 = vsel %vm1079_vm1, %v2817_v51, 0.0 }
 0x588   : > { %v2836_v48 = vsel %vm1079_vm1, %v2818_v62, 0.0  ;;  %v3092_v32 = vadd.f32 %v3091_v37, %v3090_v59 }
 0x589   : > { %v2827_v39 = vadd.f32 %v2826_v15, %v2825_v36 }
 0x58a   : > { %v3093_v0 = vrot.slane %v3092_v32, 2 }
 0x58b   : > { %v2829_v43 = vadd.f32 %v2828_v13, %v2827_v39 }
 0x58c   : > { %v3094_v54 = vadd.f32 %v3093_v0, %v3092_v32 }
 0x58d   : > { %v2831_v24 = vadd.f32 %v2830_v56, %v2829_v43 }
 0x58e   : > { %v3095_v34 = vrot.slane %v3094_v54, 1 }
 0x58f   : > { %v2833_v9 = vadd.f32 %v2832_v23, %v2831_v24 }
 0x590   : > { %v3096_v36 = vadd.f32 %v3095_v34, %v3094_v54 }
 0x591   : > { %v2835_v20 = vadd.f32 %v2834_v10, %v2833_v9 }
 0x593   : > { %v2837_v61 = vadd.f32 %v2836_v48, %v2835_v20 }
 0x595   : > { %2838 = vadd.xlane.f32.xlu1 %v2837_v61 }
 0x622   : > { %v2839_v55 = vpop.xlane.xlu1 %2838 }
 0x623   : > { %v2840_v19 = vrot.slane %v2839_v55, 4 }
 0x625   : > { %v2841_v21 = vadd.f32 %v2840_v19, %v2839_v55 }
 0x627   : > { %v2842_v27 = vrot.slane %v2841_v21, 2 }
 0x629   : > { %v2843_v53 = vadd.f32 %v2842_v27, %v2841_v21 }
 0x62b   : > { %v2844_v47 = vrot.slane %v2843_v53, 1 }
 0x62d   : > { %v2845_v29 = vadd.f32 %v2844_v47, %v2843_v53 }
 0x62f   : > { %3989 = vpush %v2845_v29 }
 0x660   : > { %s3990_s16 = spop %3989 }
 0x661   : > { %s2847_s19 = smul.f32 0.001953125, %s3990_s16 }
 0x663   : > { %s2848_s20 = sadd.f32 0.00390625, %s2847_s19 }
 0x665   : > { %v2849_v3 = vstv %s2848_s20 }
 0x666   : > { %4010 = vrsqrt.f32 %v2849_v3 }
 0x670   : > { %v4011_v35 = vpop.eup %4010 }
 0x671   : > { %3991 = vpush %v4011_v35 }
 0x672   : > { %3993 = vpush %v3096_v36 }
 0x6a2   : > { %s4817_s21 = spop %3991 }
 0x6a3   : > { %s3994_s22 = spop %3993 }
 0x6a4   : > { %s3098_s23 = smul.f32 0.001953125, %s3994_s22 }
 0x6a6   : > { %v3099_v8 = vstv %s3098_s23  ;;  %s3980_s23 = smul.u32 80, %s5081_s18 }
 0x6a7   : > { %v4820_v14 = vsub.f32 %v4651_v16, %v3099_v8  ;;  %v4823_v15 = vsub.f32 %v4647_v11, %v3099_v8  ;;  %v4826_v39 = vsub.f32 %v4660_v25, %v3099_v8  ;;  %v4829_v40 = vsub.f32 %v4655_v18, %v3099_v8 }
 0x6a8   : > { %v4832_v42 = vsub.f32 %v4667_v46, %v3099_v8  ;;  %v4839_v16 = vsub.f32 %v4665_v52, %v3099_v8  ;;  %v4846_v18 = vsub.f32 %v4677_v49, %v3099_v8  ;;  %v4854_v52 = vsub.f32 %v4675_v30, %v3099_v8 }
 0x6a9   : > { %v3110_v13 = vmul.f32 %v4820_v14, %v4820_v14  ;;  %v3111_v43 = vmul.f32 %v4823_v15, %v4823_v15  ;;  %v3112_v11 = vmul.f32 %v4826_v39, %v4826_v39  ;;  %v3113_v25 = vmul.f32 %v4829_v40, %v4829_v40 }
 0x6aa   : > { %v3114_v46 = vmul.f32 %v4832_v42, %v4832_v42  ;;  %v3115_v62 = vmul.f32 %v4839_v16, %v4839_v16  ;;  %v4862_v20 = vsub.f32 %v4684_v1, %v3099_v8  ;;  %v4869_v48 = vsub.f32 %v4682_v57, %v3099_v8 }
 0x6ab   : > { %v3120_v51 = vmul.f32 %v4731_v12, %v3110_v13  ;;  %v3121_v56 = vmul.f32 %v4737_v17, %v3111_v43  ;;  %v3122_v24 = vmul.f32 %v4743_v38, %v3112_v11  ;;  %v3123_v23 = vmul.f32 %v4754_v45, %v3113_v25 }
 0x6ac   : > { %v3116_v12 = vmul.f32 %v4846_v18, %v4846_v18  ;;  %v3124_v17 = vmul.f32 %v4767_v60, %v3114_v46  ;;  %v3117_v45 = vmul.f32 %v4854_v52, %v4854_v52  ;;  %v3125_v61 = vmul.f32 %v4779_v33, %v3115_v62 }
 0x6ad   : > { %v3130_v49 = vsel %vm1079_vm1, %v3120_v51, 0.0  ;;  %v3131_v9 = vsel %vm1079_vm1, %v3121_v56, 0.0  ;;  %v3133_v30 = vsel %vm1079_vm1, %v3122_v24, 0.0  ;;  %v3135_v55 = vsel %vm1079_vm1, %v3123_v23, 0.0  ;;  %v2729_v51 = vld [vmem:[%s5074_s6] sm:$0xff]  ;;  %v2730_v23 = vld [vmem:[%s5074_s6 + $0x8] sm:$0xff] }
 0x6ae   : > { %v3132_v10 = vadd.f32 %v3131_v9, %v3130_v49  ;;  %v3118_v19 = vmul.f32 %v4862_v20, %v4862_v20  ;;  %v3126_v21 = vmul.f32 %v4788_v50, %v3116_v12  ;;  %v3137_v60 = vsel %vm1079_vm1, %v3124_v17, 0.0  ;;  %v2731_v49 = vld [vmem:[%s5074_s6 + $0x10] sm:$0xff]  ;;  %v2732_v9 = vld [vmem:[%s5074_s6 + $0x18] sm:$0xff]  ;;  %v2733_v12 = vld [vmem:[%s5074_s6 + $0x20] sm:$0xff] }
 0x6af   : > { %v3119_v57 = vmul.f32 %v4869_v48, %v4869_v48  ;;  %v3127_v53 = vmul.f32 %v4797_v41, %v3117_v45  ;;  %v3139_v47 = vsel %vm1079_vm1, %v3125_v61, 0.0  ;;  %v2852_v46 = vstv %s4817_s21  ;;  %v2734_v17 = vld [vmem:[%s5074_s6 + $0x28] sm:$0xff] }
 0x6b0   : > { %v3134_v38 = vadd.f32 %v3133_v30, %v3132_v10  ;;  %v3128_v33 = vmul.f32 %v4804_v44, %v3118_v19  ;;  %v3141_v59 = vsel %vm1079_vm1, %v3126_v21, 0.0  ;;  %v2853_v56 = vmul.f32 %v2852_v46, %v4698_v63  ;;  %v2735_v30 = vld [vmem:[%s5074_s6 + $0x30] sm:$0xff]  ;;  %v2738_v45 = vld [vmem:[%s5074_s6 + $0x48] sm:$0xff]  ;;  %v2742_v19 = vld [vmem:[%s5075_s7 + $0x18] sm:$0xff] }
 0x6b1   : > { %v3129_v32 = vmul.f32 %v4811_v58, %v3119_v57  ;;  %v3143_v50 = vsel %vm1079_vm1, %v3127_v53, 0.0  ;;  %v2854_v24 = vmul.f32 %v2852_v46, %v4701_v2  ;;  %v2855_v62 = vmul.f32 %v2852_v46, %v4704_v5  ;;  %v2743_v53 = vld [vmem:[%s5075_s7 + $0x20] sm:$0xff] }
 0x6b2   : > { %v3136_v1 = vadd.f32 %v3135_v55, %v3134_v38  ;;  %v3145_v3 = vsel %vm1079_vm1, %v3128_v33, 0.0  ;;  %v2856_v10 = vmul.f32 %v2852_v46, %v4707_v6  ;;  %v2857_v63 = vmul.f32 %v2852_v46, %v4710_v7  ;;  %v2737_v38 = vld [vmem:[%s5074_s6 + $0x40] sm:$0xff] }
 0x6b3   : > { %v3147_v34 = vsel %vm1079_vm1, %v3129_v32, 0.0  ;;  %v2858_v2 = vmul.f32 %v2852_v46, %v4717_v22  ;;  %v2859_v5 = vmul.f32 %v2852_v46, %v4724_v28  ;;  %v2860_v6 = vmul.f32 %v2852_v46, %v4747_v26  ;;  %v2736_v28 = vld [vmem:[%s5074_s6 + $0x38] sm:$0xff]  ;;  %v2739_v26 = vld [vmem:[%s5075_s7] sm:$0xff] }
 0x6b4   : > { %v3138_v27 = vadd.f32 %v3137_v60, %v3136_v1  ;;  %v2861_v7 = vmul.f32 %v2852_v46, %v4760_v31  ;;  %v2862_v22 = vmul.f32 %v2852_v46, %v4772_v4  ;;  %v2863_v61 = vmul.f32 %v2853_v56, %v2729_v51  ;;  %v2740_v4 = vld [vmem:[%s5075_s7 + $0x8] sm:$0xff]  ;;  %v2741_v1 = vld [vmem:[%s5075_s7 + $0x10] sm:$0xff]  ;;  %v2746_v32 = vld [vmem:[%s5075_s7 + $0x38] sm:$0xff] }
 0x6b5   : > { %v2864_v31 = vmul.f32 %v2854_v24, %v2730_v23  ;;  %v2865_v55 = vmul.f32 %v2855_v62, %v2731_v49  ;;  %v2866_v21 = vmul.f32 %v2856_v10, %v2732_v9  ;;  %v2867_v60 = vmul.f32 %v2857_v63, %v2733_v12  ;;  %v3043_v46 = vld [vmem:[%s5077_s9 + $0x18] sm:$0xff]  ;;  %v3044_v51 = vld [vmem:[%s5077_s9 + $0x20] sm:$0xff]  ;;  %v3045_v56 = vld [vmem:[%s5077_s9 + $0x28] sm:$0xff] }
 0x6b6   : > { %v3140_v29 = vadd.f32 %v3139_v47, %v3138_v27  ;;  %v2868_v27 = vmul.f32 %v2858_v2, %v2734_v17  ;;  %v2869_v57 = vmul.f32 %v2859_v5, %v2735_v30  ;;  %v2744_v47 = vld [vmem:[%s5075_s7 + $0x28] sm:$0xff]  ;;  %v2870_v33 = vmul.f32 %v2860_v6, %v2736_v28  ;;  %v3046_v62 = vld [vmem:[%s5077_s9 + $0x30] sm:$0xff]  ;;  %v3047_v23 = vld [vmem:[%s5077_s9 + $0x38] sm:$0xff] }
 0x6b7   : > { %v3048_v49 = vld [vmem:[%s5077_s9 + $0x40] sm:$0xff]  ;;  %v3049_v5 = vld [vmem:[%s5077_s9 + $0x48] sm:$0xff]  ;;  %v3052_v30 = vld [vmem:[%s5078_s10 + $0x10] sm:$0xff] }
 0x6b8   : > { %v3142_v37 = vadd.f32 %v3141_v59, %v3140_v29  ;;  %v2745_v29 = vld [vmem:[%s5075_s7 + $0x30] sm:$0xff]  ;;  %v2871_v59 = vmul.f32 %v2861_v7, %v2737_v38  ;;  %v3050_v12 = vld [vmem:[%s5078_s10] sm:$0xff]  ;;  %v3051_v17 = vld [vmem:[%s5078_s10 + $0x8] sm:$0xff] }
 0x6b9   : > { %v3053_v6 = vld [vmem:[%s5078_s10 + $0x18] sm:$0xff]  ;;  %v3054_v7 = vld [vmem:[%s5078_s10 + $0x20] sm:$0xff]  ;;  %v3056_v28 = vld [vmem:[%s5078_s10 + $0x30] sm:$0xff] }
 0x6ba   : > { %v3144_v0 = vadd.f32 %v3143_v50, %v3142_v37  ;;  %v2872_v37 = vmul.f32 %v2862_v22, %v2738_v45  ;;  %v2747_v50 = vld [vmem:[%s5075_s7 + $0x40] sm:$0xff]  ;;  %v3057_v38 = vld [vmem:[%s5078_s10 + $0x38] sm:$0xff] }
 0x6bc   : > { %v3146_v54 = vadd.f32 %v3145_v3, %v3144_v0  ;;  %v2748_v0 = vld [vmem:[%s5075_s7 + $0x48] sm:$0xff]  ;;  %v4960_v3 = vadd.f32 %v2863_v61, %v2739_v26 }
 0x6be   : > { %v3148_v35 = vadd.f32 %v3147_v34, %v3146_v54  ;;  %v4962_v54 = vadd.f32 %v2864_v31, %v2740_v4  ;;  %v4964_v34 = vadd.f32 %v2865_v55, %v2741_v1  ;;  %v3059_v31 = vld [vmem:[%s5078_s10 + $0x48] sm:$0xff] }
 0x6c0   : > { %3149 = vadd.xlane.f32.xlu1 %v3148_v35  ;;  %v4966_v35 = vadd.f32 %v2866_v21, %v2742_v19 }
 0x74d   : > { %v3150_v41 = vpop.xlane.xlu1 %3149 }
 0x74e   : > { %v3151_v36 = vrot.slane %v3150_v41, 4 }
 0x750   : > { %v3152_v8 = vadd.f32 %v3151_v36, %v3150_v41  ;;  %v4968_v41 = vadd.f32 %v2867_v60, %v2743_v53  ;;  %v4970_v36 = vadd.f32 %v2868_v27, %v2744_v47 }
 0x752   : > { %v3153_v44 = vrot.slane %v3152_v8, 2 }
 0x754   : > { %v3154_v13 = vadd.f32 %v3153_v44, %v3152_v8  ;;  %v4972_v8 = vadd.f32 %v2869_v57, %v2745_v29  ;;  %v3040_v44 = vld [vmem:[%s5077_s9] sm:$0xff] }
 0x756   : > { %v3155_v43 = vrot.slane %v3154_v13, 1 }
 0x758   : > { %v3156_v11 = vadd.f32 %v3155_v43, %v3154_v13  ;;  %v3041_v13 = vld [vmem:[%s5077_s9 + $0x8] sm:$0xff]  ;;  %v3042_v43 = vld [vmem:[%s5077_s9 + $0x10] sm:$0xff] }
 0x75a   : > { %3995 = vpush %v3156_v11  ;;  %v2880_v11 = vadd.f32 %v2870_v33, %v2746_v32 }
 0x78b   : > { %s3996_s24 = spop %3995 }
 0x78c   : > { %s3158_s25 = smul.f32 0.001953125, %s3996_s24 }
 0x78e   : > { %s3159_s26 = sadd.f32 0.00390625, %s3158_s25  ;;  %s386_s25 = scalar_lea.vmem %s5079_s11, %s3980_s23 }
 0x790   : > { %v3160_v58 = vstv %s3159_s26 }
 0x791   : > { %4012 = vrsqrt.f32 %v3160_v58  ;;  %v2881_v58 = vadd.f32 %v2871_v59, %v2747_v50 }
 0x79b   : > { %v4013_v25 = vpop.eup %4012 }
 0x79c   : > { %3997 = vpush %v4013_v25  ;;  %v2882_v25 = vadd.f32 %v2872_v37, %v2748_v0 }
 0x7cd   : > { %s3998_s22 = spop %3997 }
 0x7ce   : > { %v3163_v24 = vstv %s3998_s22 }
 0x7cf   : > { %v3164_v9 = vmul.f32 %v3163_v24, %v4820_v14  ;;  %v3165_v10 = vmul.f32 %v3163_v24, %v4823_v15  ;;  %v3166_v63 = vmul.f32 %v3163_v24, %v4826_v39  ;;  %v3167_v2 = vmul.f32 %v3163_v24, %v4829_v40 }
 0x7d0   : > { %v3168_v14 = vmul.f32 %v3163_v24, %v4832_v42  ;;  %v3169_v15 = vmul.f32 %v3163_v24, %v4839_v16  ;;  %v3170_v39 = vmul.f32 %v3163_v24, %v4846_v18  ;;  %v3171_v40 = vmul.f32 %v3163_v24, %v4854_v52  ;;  %v3055_v52 = vld [vmem:[%s5078_s10 + $0x28] sm:$0xff] }
 0x7d1   : > { %v3172_v42 = vmul.f32 %v3163_v24, %v4862_v20  ;;  %v3173_v16 = vmul.f32 %v3163_v24, %v4869_v48  ;;  %v3174_v18 = vmul.f32 %v3164_v9, %v3040_v44  ;;  %v3175_v22 = vmul.f32 %v3165_v10, %v3041_v13  ;;  %v3058_v48 = vld [vmem:[%s5078_s10 + $0x40] sm:$0xff] }
 0x7d2   : > { %v3176_v45 = vmul.f32 %v3166_v63, %v3042_v43  ;;  %v3177_v26 = vmul.f32 %v3167_v2, %v3043_v46  ;;  %v3178_v20 = vmul.f32 %v3168_v14, %v3044_v51  ;;  %v3179_v61 = vmul.f32 %v3169_v15, %v3045_v56 }
 0x7d3   : > { %v3180_v55 = vmul.f32 %v3170_v39, %v3046_v62  ;;  %v3181_v4 = vmul.f32 %v3171_v40, %v3047_v23  ;;  %v3182_v1 = vmul.f32 %v3172_v42, %v3048_v49  ;;  %v3183_v19 = vmul.f32 %v3173_v16, %v3049_v5 }
 0x7d4   : > { %v3184_v21 = vadd.f32 %v3174_v18, %v3050_v12  ;;  %v3185_v60 = vadd.f32 %v3175_v22, %v3051_v17  ;;  %v3186_v27 = vadd.f32 %v3176_v45, %v3052_v30  ;;  %v3187_v57 = vadd.f32 %v3177_v26, %v3053_v6 }
 0x7d5   : > { %v3188_v53 = vadd.f32 %v3178_v20, %v3054_v7  ;;  %v3189_v47 = vadd.f32 %v3179_v61, %v3055_v52  ;;  %v3190_v29 = vadd.f32 %v3180_v55, %v3056_v28  ;;  %v3191_v33 = vadd.f32 %v3181_v4, %v3057_v38 }
 0x7d6   : > { %v3192_v59 = vadd.f32 %v3182_v1, %v3058_v48  ;;  %v3193_v37 = vadd.f32 %v3183_v19, %v3059_v31  ;;  %v3194_v32 = vadd.f32 %v3184_v21, %v4960_v3  ;;  %v3195_v50 = vadd.f32 %v3185_v60, %v4962_v54 }
 0x7d7   : > { %v3196_v0 = vadd.f32 %v3186_v27, %v4964_v34  ;;  %v3197_v44 = vadd.f32 %v3187_v57, %v4966_v35  ;;  %v3198_v13 = vadd.f32 %v3188_v53, %v4968_v41  ;;  %v3199_v43 = vadd.f32 %v3189_v47, %v4970_v36 }
 0x7d8   : > { %v3200_v46 = vadd.f32 %v3190_v29, %v4972_v8  ;;  %v3201_v51 = vadd.f32 %v3191_v33, %v2880_v11  ;;  %v3202_v56 = vadd.f32 %v3192_v59, %v2881_v58  ;;  %v3203_v24 = vadd.f32 %v3193_v37, %v2882_v25 }
 0x7d9   : > { %v3204_v3 = vmax.f32 %v3194_v32, 0.0  ;;  %v3205_v62 = vmax.f32 %v3195_v50, 0.0  ;;  %v3206_v54 = vmax.f32 %v3196_v0, 0.0  ;;  %v3207_v23 = vmax.f32 %v3197_v44, 0.0 }
 0x7da   : > { %v3208_v34 = vmax.f32 %v3198_v13, 0.0  ;;  %v3209_v49 = vmax.f32 %v3199_v43, 0.0  ;;  %v3210_v35 = vmax.f32 %v3200_v46, 0.0  ;;  %v3211_v9 = vmax.f32 %v3201_v51, 0.0 }
 0x7db   : > { %v3212_v41 = vmax.f32 %v3202_v56, 0.0  ;;  %v3213_v10 = vmax.f32 %v3203_v24, 0.0  ;;  %3214 = vst.msk [vmem:[%s386_s25] sm:$0xff] %vm1079_vm1, %v3204_v3  ;;  %3215 = vst.msk [vmem:[%s386_s25 + $0x8] sm:$0xff] %vm1079_vm1, %v3205_v62 }
 0x7dc   : > { %3216 = vst.msk [vmem:[%s386_s25 + $0x10] sm:$0xff] %vm1079_vm1, %v3206_v54  ;;  %3217 = vst.msk [vmem:[%s386_s25 + $0x18] sm:$0xff] %vm1079_vm1, %v3207_v23 }
 0x7dd   : > { %3218 = vst.msk [vmem:[%s386_s25 + $0x20] sm:$0xff] %vm1079_vm1, %v3208_v34  ;;  %3219 = vst.msk [vmem:[%s386_s25 + $0x28] sm:$0xff] %vm1079_vm1, %v3209_v49 }
 0x7de   : > { %3220 = vst.msk [vmem:[%s386_s25 + $0x30] sm:$0xff] %vm1079_vm1, %v3210_v35  ;;  %3221 = vst.msk [vmem:[%s386_s25 + $0x38] sm:$0xff] %vm1079_vm1, %v3211_v9 }
 0x7df   : > { %3222 = vst.msk [vmem:[%s386_s25 + $0x40] sm:$0xff] %vm1079_vm1, %v3212_v41  ;;  %3223 = vst.msk [vmem:[%s386_s25 + $0x48] sm:$0xff] %vm1079_vm1, %v3213_v10 }
 0x7e0 PF: > { %s21_s17 = sadd.s32 1, %s4030_s17  }
 0x7e1   : > { %p18_p4 = scmp.ge.s32.totalorder %s21_s17, 4  }
 0x7e3   :  { %20 = sbr.rel (!%p18_p4) target bundleno = 1 (0x1), region = 105 }

</bundles_post_ra>
